<compile_context>
chip_gen: v6e
topology: v6e:2x2x1
jax: 0.10.0
libtpu: 0.0.40
codegen_flags: <defaults>
</compile_context>

<pallas_src>
import functools

import jax
import jax.numpy as jnp
from jax.experimental import pallas as pl
from jax.experimental.pallas import tpu as pltpu

LANE = 128


# ----------------------------------------------------------------------------
# Fused kernel: masked mean-pool (both branches) + pooler dense+tanh + collapsed
# 4-layer head (one dot per branch half) + bias.
# ----------------------------------------------------------------------------
def _bt_fused_kernel(mt_ref, mc_ref, xt_ref, xc_ref,
                     wpt_ref, bpt_ref, wpc_ref, bpc_ref,
                     wht_ref, whc_ref, bh_ref,
                     o_ref):
    tile_b, S, Ht = xt_ref.shape
    Hc = xc_ref.shape[2]

    mt = mt_ref[...]          # [tile_b, S] f32 {0,1}
    mc = mc_ref[...]

    # Masked mean-pool, statically unrolled over S (2-D VPU ops only).
    # TODO(synk): for long sequences switch to a fori_loop / 3-D reduction.
    pt = jnp.zeros((tile_b, Ht), jnp.float32)
    pc = jnp.zeros((tile_b, Hc), jnp.float32)
    for s in range(S):
        pt = pt + xt_ref[:, s, :] * mt[:, s:s + 1]
        pc = pc + xc_ref[:, s, :] * mc[:, s:s + 1]
    pt = pt / jnp.maximum(jnp.sum(mt, axis=1, keepdims=True), 1.0)
    pc = pc / jnp.maximum(jnp.sum(mc, axis=1, keepdims=True), 1.0)

    # Pooler dense + tanh per branch: dots may run in bf16 (MXU native on
    # v6e/v7x); accumulation and all elementwise ops stay f32 (v5e-safe).
    t = jnp.tanh(jnp.dot(pt.astype(wpt_ref.dtype), wpt_ref[...],
                         preferred_element_type=jnp.float32) + bpt_ref[...])
    c = jnp.tanh(jnp.dot(pc.astype(wpc_ref.dtype), wpc_ref[...],
                         preferred_element_type=jnp.float32) + bpc_ref[...])

    # Collapsed head: W_head precomputed host-side (x10 folded, f32-combined),
    # split into code/text halves (kills the concat), lane-padded to 128 cols.
    h = (jnp.dot(c.astype(whc_ref.dtype), whc_ref[...],
                 preferred_element_type=jnp.float32)
         + jnp.dot(t.astype(wht_ref.dtype), wht_ref[...],
                   preferred_element_type=jnp.float32)
         + bh_ref[...])
    o_ref[...] = h.astype(o_ref.dtype)


# ----------------------------------------------------------------------------
# Host-side parameter prep -- run ONCE at parameter-load time (not per step).
# ----------------------------------------------------------------------------
def prep_kernel_params(head_params, enc_params, code_hidden_size,
                       dot_dtype=jnp.bfloat16):
    # Collapse fc->fc1->fc2->fc3 (no nonlinearity between them) in f32.
    w_head = ((head_params["w0"] * 10.0) @ head_params["w1"]
              @ head_params["w2"] @ head_params["w3"])
    b_head = (((head_params["b0"] @ head_params["w1"] + head_params["b1"])
               @ head_params["w2"] + head_params["b2"])
              @ head_params["w3"] + head_params["b3"])

    n_cls = int(w_head.shape[1])
    n_pad = ((n_cls + LANE - 1) // LANE) * LANE          # lane-dense output
    w_head_p = jnp.zeros((w_head.shape[0], n_pad), jnp.float32)
    w_head_p = w_head_p.at[:, :n_cls].set(w_head)
    b_head_p = jnp.zeros((1, n_pad), jnp.float32).at[:, :n_cls].set(b_head)

    wd = lambda w: w.astype(dot_dtype)
    kp = dict(
        wpt=wd(enc_params["text_w"]),
        bpt=enc_params["text_b"].reshape(1, -1).astype(jnp.float32),
        wpc=wd(enc_params["code_w"]),
        bpc=enc_params["code_b"].reshape(1, -1).astype(jnp.float32),
        wht=wd(w_head_p[code_hidden_size:]),   # concat order was [code, text]
        whc=wd(w_head_p[:code_hidden_size]),
        bh=b_head_p,
    )
    return kp, n_cls


# ----------------------------------------------------------------------------
# pallas_call wrapper: grid over batch, weights resident & single-buffered.
# ----------------------------------------------------------------------------
def bt_fused_pallas(text_mask, code_mask, text_emb, code_emb, kp, *,
                    num_class, tile_b=512):
    B, S, Ht = text_emb.shape
    Hc = code_emb.shape[2]
    n_pad = kp["wht"].shape[1]

    # Batch tile: multiple of 8 sublanes; force >=2 grid steps when possible so
    # dimension_semantics=("parallel",) can shard across both v7x TensorCores.
    b_ceil8 = ((B + 7) // 8) * 8
    tile_b = max(8, min((tile_b // 8) * 8, b_ceil8))
    if b_ceil8 >= 16 and b_ceil8 // tile_b < 2:
        tile_b = ((b_ceil8 // 2 + 7) // 8) * 8
    b_pad = ((B + tile_b - 1) // tile_b) * tile_b

    if b_pad != B:
        pb = (0, b_pad - B)
        text_mask = jnp.pad(text_mask, (pb, (0, 0)))      # pad rows mask=0
        code_mask = jnp.pad(code_mask, (pb, (0, 0)))
        text_emb = jnp.pad(text_emb, (pb, (0, 0), (0, 0)))
        code_emb = jnp.pad(code_emb, (pb, (0, 0), (0, 0)))

    weights = (kp["wpt"], kp["bpt"], kp["wpc"], kp["bpc"],
               kp["wht"], kp["whc"], kp["bh"])
    operands = (text_mask, code_mask, text_emb, code_emb) + weights

    def resident(a):  # constant index_map + single buffer -> stays in VMEM once
        return pl.BlockSpec(a.shape, lambda i, n=a.ndim: (0,) * n,
                            pipeline_mode=pl.Buffered(1))

    in_specs = ([pl.BlockSpec((tile_b, S), lambda i: (i, 0)),
                 pl.BlockSpec((tile_b, S), lambda i: (i, 0)),
                 pl.BlockSpec((tile_b, S, Ht), lambda i: (i, 0, 0)),
                 pl.BlockSpec((tile_b, S, Hc), lambda i: (i, 0, 0))]
                + [resident(a) for a in weights])
    out_specs = pl.BlockSpec((tile_b, n_pad), lambda i: (i, 0))

    # Advisory cost estimate (pool + 2 pooler dots + 2 head half-dots).
    flops = 2 * b_pad * (S * (Ht + Hc) + Ht * Ht + Hc * Hc + (Ht + Hc) * n_pad)
    bytes_accessed = (sum(int(a.size) * jnp.dtype(a.dtype).itemsize
                          for a in operands) + b_pad * n_pad * 4)
    cost = pl.CostEstimate(flops=flops,
                           transcendentals=b_pad * (Ht + Hc),
                           bytes_accessed=bytes_accessed)

    # Explicit VMEM budget: single-buffered weights + double-buffered acts/out.
    weight_bytes = sum(int(a.size) * jnp.dtype(a.dtype).itemsize for a in weights)
    act_bytes = 2 * tile_b * S * (Ht + Hc + 2) * 4
    out_bytes = 2 * tile_b * n_pad * 4
    vmem_need = weight_bytes + act_bytes + out_bytes
    vmem_limit = int(min(max(vmem_need * 5 // 4 + (1 << 20), 32 << 20), 48 << 20))

    out = pl.pallas_call(
        _bt_fused_kernel,
        out_shape=jax.ShapeDtypeStruct((b_pad, n_pad), jnp.float32),
        grid=(b_pad // tile_b,),
        in_specs=in_specs,
        out_specs=out_specs,
        compiler_params=pltpu.CompilerParams(
            dimension_semantics=("parallel",),
            vmem_limit_bytes=vmem_limit),
        cost_estimate=cost,
    )(*operands)
    return out[:B, :num_class]


# ----------------------------------------------------------------------------
# Deterministic parameter construction (matches nn.Linear shapes of BTModel).
# Weights stored transposed as [in, out] so the math is x @ W + b.
# ----------------------------------------------------------------------------
def make_bt_params(key, text_hidden_size, code_hidden_size, num_class):
    fc_in = code_hidden_size + text_hidden_size
    dims = [fc_in, int(fc_in / 2), int(fc_in / 4), int(fc_in / 6), num_class]
    params = {}
    for i in range(4):
        key, kw, kb = jax.random.split(key, 3)
        fan_in, fan_out = dims[i], dims[i + 1]
        bound = 1.0 / (fan_in ** 0.5)
        params[f"w{i}"] = jax.random.uniform(
            kw, (fan_in, fan_out), jnp.float32, -bound, bound)
        params[f"b{i}"] = jax.random.uniform(
            kb, (1, fan_out), jnp.float32, -bound, bound)
    return params


# ----------------------------------------------------------------------------
# Forward pass matching BTModel.forward (embeds branch).
# TODO(synk): textEncoder / codeEncoder are externally injected transformer
# modules with no definition in the source file; replaced by masked-mean-pool
# stub encoders whose tanh pooler dense is fused into the Pallas kernel.
# Masks / position ids kept verbatim from the PyTorch module, including its
# asymmetry (code position ids use pad id 0, code attention mask uses pad id 1).
# ----------------------------------------------------------------------------
def bt_model_forward(kp, text_input_ids, code_input_ids,
                     text_inputs_embeds, code_inputs_embeds, *, num_class):
    mask = (text_input_ids != 1).astype(jnp.int32)
    text_position_ids = (jnp.cumsum(mask, axis=1) * mask) + 1
    mask2 = (code_input_ids != 0).astype(jnp.int32)
    code_position_ids = (jnp.cumsum(mask2, axis=1) * mask2) + 0
    del text_position_ids, code_position_ids  # unused by the stub encoders

    text_mask = (text_input_ids != 1).astype(jnp.float32)
    code_mask = (code_input_ids != 1).astype(jnp.float32)

    logits = bt_fused_pallas(text_mask, code_mask,
                             text_inputs_embeds, code_inputs_embeds,
                             kp, num_class=num_class)
    return logits, text_input_ids, code_input_ids


# pure-JAX reference (original op order: pool -> pooler -> concat*10 -> 4 fcs)
def bt_model_ref(head, enc, text_ids, code_ids, text_emb, code_emb):
    def stub_enc(emb, attn_mask, w, b):
        m = attn_mask.astype(jnp.float32)[..., None]
        pooled = (emb * m).sum(1) / jnp.maximum(m.sum(1), 1.0)
        return jnp.tanh(pooled @ w + b)

    t_out = stub_enc(text_emb, text_ids != 1, enc["text_w"], enc["text_b"])
    c_out = stub_enc(code_emb, code_ids != 1, enc["code_w"], enc["code_b"])
    h = jnp.concatenate([c_out, t_out], axis=-1) * 10.0
    h = h @ head["w0"] + head["b0"]
    h = h @ head["w1"] + head["b1"]
    h = h @ head["w2"] + head["b2"]
    h = h @ head["w3"] + head["b3"]
    return h


if __name__ == "__main__":
    B, S = 8, 8
    text_hidden_size, code_hidden_size, num_class = 32, 32, 4

    root = jax.random.PRNGKey(0)
    k_par, k_enc_t, k_enc_c, k_tid, k_cid, k_temb, k_cemb = jax.random.split(root, 7)

    head_params = make_bt_params(k_par, text_hidden_size, code_hidden_size, num_class)
    enc_params = {
        "text_w": jax.random.normal(k_enc_t, (text_hidden_size, text_hidden_size),
                                    jnp.float32) * 0.05,
        "text_b": jnp.zeros((text_hidden_size,), jnp.float32),
        "code_w": jax.random.normal(k_enc_c, (code_hidden_size, code_hidden_size),
                                    jnp.float32) * 0.05,
        "code_b": jnp.zeros((code_hidden_size,), jnp.float32),
    }

    text_input_ids = jax.random.randint(k_tid, (B, S), 0, 100, jnp.int32)
    code_input_ids = jax.random.randint(k_cid, (B, S), 0, 100, jnp.int32)
    text_inputs_embeds = jax.random.normal(k_temb, (B, S, text_hidden_size), jnp.float32)
    code_inputs_embeds = jax.random.normal(k_cemb, (B, S, code_hidden_size), jnp.float32)

    # Parameter prep (x10 fold, head collapse, lane-pad, dtype cast) happens
    # ONCE here, outside the jitted per-step forward path.
    kp_bf16, n_cls = prep_kernel_params(head_params, enc_params,
                                        code_hidden_size, jnp.bfloat16)
    kp_f32, _ = prep_kernel_params(head_params, enc_params,
                                   code_hidden_size, jnp.float32)

    fwd = jax.jit(functools.partial(bt_model_forward, num_class=n_cls))

    logits_bf16, t_ids, c_ids = fwd(kp_bf16, text_input_ids, code_input_ids,
                                    text_inputs_embeds, code_inputs_embeds)
    jax.block_until_ready(logits_bf16)
    logits_f32, _, _ = fwd(kp_f32, text_input_ids, code_input_ids,
                           text_inputs_embeds, code_inputs_embeds)
    jax.block_until_ready(logits_f32)

    ref = bt_model_ref(head_params, enc_params,
                       text_input_ids, code_input_ids,
                       text_inputs_embeds, code_inputs_embeds)

    assert logits_f32.shape == (B, num_class)
    assert jnp.allclose(logits_f32, ref, atol=1e-3, rtol=1e-3), "f32 path mismatch"
    assert jnp.allclose(logits_bf16, ref, atol=1e-1, rtol=1e-1), "bf16 path mismatch"
    assert jnp.array_equal(t_ids, text_input_ids)
    assert jnp.array_equal(c_ids, code_input_ids)

    print("KERNEL_OK")
</pallas_src>

<mosaic_0001>
module attributes {stable_mosaic.version = 11 : i64} {
  func.func @_bt_fused_kernel(%arg0: i32, %arg1: memref<8x8xf32, #tpu.memory_space<vmem>>, %arg2: memref<8x8xf32, #tpu.memory_space<vmem>>, %arg3: memref<8x8x32xf32, #tpu.memory_space<vmem>>, %arg4: memref<8x8x32xf32, #tpu.memory_space<vmem>>, %arg5: memref<32x32xbf16, #tpu.memory_space<vmem>>, %arg6: memref<1x32xf32, #tpu.memory_space<vmem>>, %arg7: memref<32x32xbf16, #tpu.memory_space<vmem>>, %arg8: memref<1x32xf32, #tpu.memory_space<vmem>>, %arg9: memref<32x128xbf16, #tpu.memory_space<vmem>>, %arg10: memref<32x128xbf16, #tpu.memory_space<vmem>>, %arg11: memref<1x128xf32, #tpu.memory_space<vmem>>, %arg12: memref<8x128xf32, #tpu.memory_space<vmem>>) attributes {dimension_semantics = [#tpu.dimension_semantics<parallel>], iteration_bounds = array<i64: 1>, scalar_prefetch = 0 : i64, scratch_operands = 0 : i64, tpu.core_type = #tpu.core_type<tc>, window_params = [{transform_indices = @transform_0, window_bounds = array<i64: 8, 8>}, {transform_indices = @transform_1, window_bounds = array<i64: 8, 8>}, {transform_indices = @transform_2, window_bounds = array<i64: 8, 8, 32>}, {transform_indices = @transform_3, window_bounds = array<i64: 8, 8, 32>}, {pipeline_mode = #tpu.pipeline_mode<synchronous>, transform_indices = @transform_4, window_bounds = array<i64: 32, 32>}, {pipeline_mode = #tpu.pipeline_mode<synchronous>, transform_indices = @transform_5, window_bounds = array<i64: 1, 32>}, {pipeline_mode = #tpu.pipeline_mode<synchronous>, transform_indices = @transform_6, window_bounds = array<i64: 32, 32>}, {pipeline_mode = #tpu.pipeline_mode<synchronous>, transform_indices = @transform_7, window_bounds = array<i64: 1, 32>}, {pipeline_mode = #tpu.pipeline_mode<synchronous>, transform_indices = @transform_8, window_bounds = array<i64: 32, 128>}, {pipeline_mode = #tpu.pipeline_mode<synchronous>, transform_indices = @transform_9, window_bounds = array<i64: 32, 128>}, {pipeline_mode = #tpu.pipeline_mode<synchronous>, transform_indices = @transform_10, window_bounds = array<i64: 1, 128>}, {transform_indices = @transform_11, window_bounds = array<i64: 8, 128>}]} {
    %c0 = arith.constant 0 : index
    %c0_0 = arith.constant 0 : index
    %0 = vector.load %arg1[%c0, %c0_0] : memref<8x8xf32, #tpu.memory_space<vmem>>, vector<8x8xf32>
    %c0_1 = arith.constant 0 : index
    %c0_2 = arith.constant 0 : index
    %1 = vector.load %arg2[%c0_1, %c0_2] : memref<8x8xf32, #tpu.memory_space<vmem>>, vector<8x8xf32>
    %cst = arith.constant 0.000000e+00 : f32
    %2 = vector.broadcast %cst : f32 to vector<8x32xf32>
    %cst_3 = arith.constant 0.000000e+00 : f32
    %3 = vector.broadcast %cst_3 : f32 to vector<8x32xf32>
    %c0_4 = arith.constant 0 : index
    %c0_5 = arith.constant 0 : index
    %c0_6 = arith.constant 0 : index
    %4 = vector.load %arg3[%c0_4, %c0_5, %c0_6] : memref<8x8x32xf32, #tpu.memory_space<vmem>>, vector<8x1x32xf32>
    %5 = vector.shape_cast %4 : vector<8x1x32xf32> to vector<8x32xf32>
    %6 = vector.extract_strided_slice %0 {offsets = [0, 0], sizes = [8, 1], strides = [1, 1]} : vector<8x8xf32> to vector<8x1xf32>
    %7 = vector.broadcast %6 : vector<8x1xf32> to vector<8x32xf32>
    %8 = arith.mulf %5, %7 : vector<8x32xf32>
    %9 = arith.addf %2, %8 : vector<8x32xf32>
    %c0_7 = arith.constant 0 : index
    %c0_8 = arith.constant 0 : index
    %c0_9 = arith.constant 0 : index
    %10 = vector.load %arg4[%c0_7, %c0_8, %c0_9] : memref<8x8x32xf32, #tpu.memory_space<vmem>>, vector<8x1x32xf32>
    %11 = vector.shape_cast %10 : vector<8x1x32xf32> to vector<8x32xf32>
    %12 = vector.extract_strided_slice %1 {offsets = [0, 0], sizes = [8, 1], strides = [1, 1]} : vector<8x8xf32> to vector<8x1xf32>
    %13 = vector.broadcast %12 : vector<8x1xf32> to vector<8x32xf32>
    %14 = arith.mulf %11, %13 : vector<8x32xf32>
    %15 = arith.addf %3, %14 : vector<8x32xf32>
    %c0_10 = arith.constant 0 : index
    %c1 = arith.constant 1 : index
    %c0_11 = arith.constant 0 : index
    %16 = vector.load %arg3[%c0_10, %c1, %c0_11] : memref<8x8x32xf32, #tpu.memory_space<vmem>>, vector<8x1x32xf32>
    %17 = vector.shape_cast %16 : vector<8x1x32xf32> to vector<8x32xf32>
    %18 = vector.extract_strided_slice %0 {offsets = [0, 1], sizes = [8, 1], strides = [1, 1]} : vector<8x8xf32> to vector<8x1xf32>
    %19 = vector.broadcast %18 : vector<8x1xf32> to vector<8x32xf32>
    %20 = arith.mulf %17, %19 : vector<8x32xf32>
    %21 = arith.addf %9, %20 : vector<8x32xf32>
    %c0_12 = arith.constant 0 : index
    %c1_13 = arith.constant 1 : index
    %c0_14 = arith.constant 0 : index
    %22 = vector.load %arg4[%c0_12, %c1_13, %c0_14] : memref<8x8x32xf32, #tpu.memory_space<vmem>>, vector<8x1x32xf32>
    %23 = vector.shape_cast %22 : vector<8x1x32xf32> to vector<8x32xf32>
    %24 = vector.extract_strided_slice %1 {offsets = [0, 1], sizes = [8, 1], strides = [1, 1]} : vector<8x8xf32> to vector<8x1xf32>
    %25 = vector.broadcast %24 : vector<8x1xf32> to vector<8x32xf32>
    %26 = arith.mulf %23, %25 : vector<8x32xf32>
    %27 = arith.addf %15, %26 : vector<8x32xf32>
    %c0_15 = arith.constant 0 : index
    %c2 = arith.constant 2 : index
    %c0_16 = arith.constant 0 : index
    %28 = vector.load %arg3[%c0_15, %c2, %c0_16] : memref<8x8x32xf32, #tpu.memory_space<vmem>>, vector<8x1x32xf32>
    %29 = vector.shape_cast %28 : vector<8x1x32xf32> to vector<8x32xf32>
    %30 = vector.extract_strided_slice %0 {offsets = [0, 2], sizes = [8, 1], strides = [1, 1]} : vector<8x8xf32> to vector<8x1xf32>
    %31 = vector.broadcast %30 : vector<8x1xf32> to vector<8x32xf32>
    %32 = arith.mulf %29, %31 : vector<8x32xf32>
    %33 = arith.addf %21, %32 : vector<8x32xf32>
    %c0_17 = arith.constant 0 : index
    %c2_18 = arith.constant 2 : index
    %c0_19 = arith.constant 0 : index
    %34 = vector.load %arg4[%c0_17, %c2_18, %c0_19] : memref<8x8x32xf32, #tpu.memory_space<vmem>>, vector<8x1x32xf32>
    %35 = vector.shape_cast %34 : vector<8x1x32xf32> to vector<8x32xf32>
    %36 = vector.extract_strided_slice %1 {offsets = [0, 2], sizes = [8, 1], strides = [1, 1]} : vector<8x8xf32> to vector<8x1xf32>
    %37 = vector.broadcast %36 : vector<8x1xf32> to vector<8x32xf32>
    %38 = arith.mulf %35, %37 : vector<8x32xf32>
    %39 = arith.addf %27, %38 : vector<8x32xf32>
    %c0_20 = arith.constant 0 : index
    %c3 = arith.constant 3 : index
    %c0_21 = arith.constant 0 : index
    %40 = vector.load %arg3[%c0_20, %c3, %c0_21] : memref<8x8x32xf32, #tpu.memory_space<vmem>>, vector<8x1x32xf32>
    %41 = vector.shape_cast %40 : vector<8x1x32xf32> to vector<8x32xf32>
    %42 = vector.extract_strided_slice %0 {offsets = [0, 3], sizes = [8, 1], strides = [1, 1]} : vector<8x8xf32> to vector<8x1xf32>
    %43 = vector.broadcast %42 : vector<8x1xf32> to vector<8x32xf32>
    %44 = arith.mulf %41, %43 : vector<8x32xf32>
    %45 = arith.addf %33, %44 : vector<8x32xf32>
    %c0_22 = arith.constant 0 : index
    %c3_23 = arith.constant 3 : index
    %c0_24 = arith.constant 0 : index
    %46 = vector.load %arg4[%c0_22, %c3_23, %c0_24] : memref<8x8x32xf32, #tpu.memory_space<vmem>>, vector<8x1x32xf32>
    %47 = vector.shape_cast %46 : vector<8x1x32xf32> to vector<8x32xf32>
    %48 = vector.extract_strided_slice %1 {offsets = [0, 3], sizes = [8, 1], strides = [1, 1]} : vector<8x8xf32> to vector<8x1xf32>
    %49 = vector.broadcast %48 : vector<8x1xf32> to vector<8x32xf32>
    %50 = arith.mulf %47, %49 : vector<8x32xf32>
    %51 = arith.addf %39, %50 : vector<8x32xf32>
    %c0_25 = arith.constant 0 : index
    %c4 = arith.constant 4 : index
    %c0_26 = arith.constant 0 : index
    %52 = vector.load %arg3[%c0_25, %c4, %c0_26] : memref<8x8x32xf32, #tpu.memory_space<vmem>>, vector<8x1x32xf32>
    %53 = vector.shape_cast %52 : vector<8x1x32xf32> to vector<8x32xf32>
    %54 = vector.extract_strided_slice %0 {offsets = [0, 4], sizes = [8, 1], strides = [1, 1]} : vector<8x8xf32> to vector<8x1xf32>
    %55 = vector.broadcast %54 : vector<8x1xf32> to vector<8x32xf32>
    %56 = arith.mulf %53, %55 : vector<8x32xf32>
    %57 = arith.addf %45, %56 : vector<8x32xf32>
    %c0_27 = arith.constant 0 : index
    %c4_28 = arith.constant 4 : index
    %c0_29 = arith.constant 0 : index
    %58 = vector.load %arg4[%c0_27, %c4_28, %c0_29] : memref<8x8x32xf32, #tpu.memory_space<vmem>>, vector<8x1x32xf32>
    %59 = vector.shape_cast %58 : vector<8x1x32xf32> to vector<8x32xf32>
    %60 = vector.extract_strided_slice %1 {offsets = [0, 4], sizes = [8, 1], strides = [1, 1]} : vector<8x8xf32> to vector<8x1xf32>
    %61 = vector.broadcast %60 : vector<8x1xf32> to vector<8x32xf32>
    %62 = arith.mulf %59, %61 : vector<8x32xf32>
    %63 = arith.addf %51, %62 : vector<8x32xf32>
    %c0_30 = arith.constant 0 : index
    %c5 = arith.constant 5 : index
    %c0_31 = arith.constant 0 : index
    %64 = vector.load %arg3[%c0_30, %c5, %c0_31] : memref<8x8x32xf32, #tpu.memory_space<vmem>>, vector<8x1x32xf32>
    %65 = vector.shape_cast %64 : vector<8x1x32xf32> to vector<8x32xf32>
    %66 = vector.extract_strided_slice %0 {offsets = [0, 5], sizes = [8, 1], strides = [1, 1]} : vector<8x8xf32> to vector<8x1xf32>
    %67 = vector.broadcast %66 : vector<8x1xf32> to vector<8x32xf32>
    %68 = arith.mulf %65, %67 : vector<8x32xf32>
    %69 = arith.addf %57, %68 : vector<8x32xf32>
    %c0_32 = arith.constant 0 : index
    %c5_33 = arith.constant 5 : index
    %c0_34 = arith.constant 0 : index
    %70 = vector.load %arg4[%c0_32, %c5_33, %c0_34] : memref<8x8x32xf32, #tpu.memory_space<vmem>>, vector<8x1x32xf32>
    %71 = vector.shape_cast %70 : vector<8x1x32xf32> to vector<8x32xf32>
    %72 = vector.extract_strided_slice %1 {offsets = [0, 5], sizes = [8, 1], strides = [1, 1]} : vector<8x8xf32> to vector<8x1xf32>
    %73 = vector.broadcast %72 : vector<8x1xf32> to vector<8x32xf32>
    %74 = arith.mulf %71, %73 : vector<8x32xf32>
    %75 = arith.addf %63, %74 : vector<8x32xf32>
    %c0_35 = arith.constant 0 : index
    %c6 = arith.constant 6 : index
    %c0_36 = arith.constant 0 : index
    %76 = vector.load %arg3[%c0_35, %c6, %c0_36] : memref<8x8x32xf32, #tpu.memory_space<vmem>>, vector<8x1x32xf32>
    %77 = vector.shape_cast %76 : vector<8x1x32xf32> to vector<8x32xf32>
    %78 = vector.extract_strided_slice %0 {offsets = [0, 6], sizes = [8, 1], strides = [1, 1]} : vector<8x8xf32> to vector<8x1xf32>
    %79 = vector.broadcast %78 : vector<8x1xf32> to vector<8x32xf32>
    %80 = arith.mulf %77, %79 : vector<8x32xf32>
    %81 = arith.addf %69, %80 : vector<8x32xf32>
    %c0_37 = arith.constant 0 : index
    %c6_38 = arith.constant 6 : index
    %c0_39 = arith.constant 0 : index
    %82 = vector.load %arg4[%c0_37, %c6_38, %c0_39] : memref<8x8x32xf32, #tpu.memory_space<vmem>>, vector<8x1x32xf32>
    %83 = vector.shape_cast %82 : vector<8x1x32xf32> to vector<8x32xf32>
    %84 = vector.extract_strided_slice %1 {offsets = [0, 6], sizes = [8, 1], strides = [1, 1]} : vector<8x8xf32> to vector<8x1xf32>
    %85 = vector.broadcast %84 : vector<8x1xf32> to vector<8x32xf32>
    %86 = arith.mulf %83, %85 : vector<8x32xf32>
    %87 = arith.addf %75, %86 : vector<8x32xf32>
    %c0_40 = arith.constant 0 : index
    %c7 = arith.constant 7 : index
    %c0_41 = arith.constant 0 : index
    %88 = vector.load %arg3[%c0_40, %c7, %c0_41] : memref<8x8x32xf32, #tpu.memory_space<vmem>>, vector<8x1x32xf32>
    %89 = vector.shape_cast %88 : vector<8x1x32xf32> to vector<8x32xf32>
    %90 = vector.extract_strided_slice %0 {offsets = [0, 7], sizes = [8, 1], strides = [1, 1]} : vector<8x8xf32> to vector<8x1xf32>
    %91 = vector.broadcast %90 : vector<8x1xf32> to vector<8x32xf32>
    %92 = arith.mulf %89, %91 : vector<8x32xf32>
    %93 = arith.addf %81, %92 : vector<8x32xf32>
    %c0_42 = arith.constant 0 : index
    %c7_43 = arith.constant 7 : index
    %c0_44 = arith.constant 0 : index
    %94 = vector.load %arg4[%c0_42, %c7_43, %c0_44] : memref<8x8x32xf32, #tpu.memory_space<vmem>>, vector<8x1x32xf32>
    %95 = vector.shape_cast %94 : vector<8x1x32xf32> to vector<8x32xf32>
    %96 = vector.extract_strided_slice %1 {offsets = [0, 7], sizes = [8, 1], strides = [1, 1]} : vector<8x8xf32> to vector<8x1xf32>
    %97 = vector.broadcast %96 : vector<8x1xf32> to vector<8x32xf32>
    %98 = arith.mulf %95, %97 : vector<8x32xf32>
    %99 = arith.addf %87, %98 : vector<8x32xf32>
    %cst_45 = arith.constant dense<0.000000e+00> : vector<8xf32>
    %100 = vector.multi_reduction <add>, %0, %cst_45 [1] : vector<8x8xf32> to vector<8xf32>
    %101 = vector.shape_cast %100 : vector<8xf32> to vector<8x1xf32>
    %cst_46 = arith.constant 1.000000e+00 : f32
    %102 = vector.broadcast %cst_46 : f32 to vector<8x1xf32>
    %103 = arith.maximumf %101, %102 : vector<8x1xf32>
    %104 = vector.broadcast %103 : vector<8x1xf32> to vector<8x32xf32>
    %105 = arith.divf %93, %104 : vector<8x32xf32>
    %cst_47 = arith.constant dense<0.000000e+00> : vector<8xf32>
    %106 = vector.multi_reduction <add>, %1, %cst_47 [1] : vector<8x8xf32> to vector<8xf32>
    %107 = vector.shape_cast %106 : vector<8xf32> to vector<8x1xf32>
    %cst_48 = arith.constant 1.000000e+00 : f32
    %108 = vector.broadcast %cst_48 : f32 to vector<8x1xf32>
    %109 = arith.maximumf %107, %108 : vector<8x1xf32>
    %110 = vector.broadcast %109 : vector<8x1xf32> to vector<8x32xf32>
    %111 = arith.divf %99, %110 : vector<8x32xf32>
    %112 = arith.truncf %105 : vector<8x32xf32> to vector<8x32xbf16>
    %c0_49 = arith.constant 0 : index
    %c0_50 = arith.constant 0 : index
    %113 = vector.load %arg5[%c0_49, %c0_50] : memref<32x32xbf16, #tpu.memory_space<vmem>>, vector<32x32xbf16>
    %cst_51 = arith.constant dense<0.000000e+00> : vector<8x32xf32>
    %114 = tpu.matmul %112, %113, %cst_51 {dimension_numbers = #tpu.dot_dimension_numbers<[1], [0], [0], [1], [0, 0, 1, 1], [], []>} : vector<8x32xbf16>, vector<32x32xbf16>, vector<8x32xf32> -> vector<8x32xf32>
    %c0_52 = arith.constant 0 : index
    %c0_53 = arith.constant 0 : index
    %115 = vector.load %arg6[%c0_52, %c0_53] : memref<1x32xf32, #tpu.memory_space<vmem>>, vector<1x32xf32>
    %116 = vector.broadcast %115 : vector<1x32xf32> to vector<8x32xf32>
    %117 = arith.addf %114, %116 : vector<8x32xf32>
    %118 = math.tanh %117 : vector<8x32xf32>
    %119 = arith.truncf %111 : vector<8x32xf32> to vector<8x32xbf16>
    %c0_54 = arith.constant 0 : index
    %c0_55 = arith.constant 0 : index
    %120 = vector.load %arg7[%c0_54, %c0_55] : memref<32x32xbf16, #tpu.memory_space<vmem>>, vector<32x32xbf16>
    %cst_56 = arith.constant dense<0.000000e+00> : vector<8x32xf32>
    %121 = tpu.matmul %119, %120, %cst_56 {dimension_numbers = #tpu.dot_dimension_numbers<[1], [0], [0], [1], [0, 0, 1, 1], [], []>} : vector<8x32xbf16>, vector<32x32xbf16>, vector<8x32xf32> -> vector<8x32xf32>
    %c0_57 = arith.constant 0 : index
    %c0_58 = arith.constant 0 : index
    %122 = vector.load %arg8[%c0_57, %c0_58] : memref<1x32xf32, #tpu.memory_space<vmem>>, vector<1x32xf32>
    %123 = vector.broadcast %122 : vector<1x32xf32> to vector<8x32xf32>
    %124 = arith.addf %121, %123 : vector<8x32xf32>
    %125 = math.tanh %124 : vector<8x32xf32>
    %126 = arith.truncf %125 : vector<8x32xf32> to vector<8x32xbf16>
    %c0_59 = arith.constant 0 : index
    %c0_60 = arith.constant 0 : index
    %127 = vector.load %arg10[%c0_59, %c0_60] : memref<32x128xbf16, #tpu.memory_space<vmem>>, vector<32x128xbf16>
    %cst_61 = arith.constant dense<0.000000e+00> : vector<8x128xf32>
    %128 = tpu.matmul %126, %127, %cst_61 {dimension_numbers = #tpu.dot_dimension_numbers<[1], [0], [0], [1], [0, 0, 1, 1], [], []>} : vector<8x32xbf16>, vector<32x128xbf16>, vector<8x128xf32> -> vector<8x128xf32>
    %129 = arith.truncf %118 : vector<8x32xf32> to vector<8x32xbf16>
    %c0_62 = arith.constant 0 : index
    %c0_63 = arith.constant 0 : index
    %130 = vector.load %arg9[%c0_62, %c0_63] : memref<32x128xbf16, #tpu.memory_space<vmem>>, vector<32x128xbf16>
    %cst_64 = arith.constant dense<0.000000e+00> : vector<8x128xf32>
    %131 = tpu.matmul %129, %130, %cst_64 {dimension_numbers = #tpu.dot_dimension_numbers<[1], [0], [0], [1], [0, 0, 1, 1], [], []>} : vector<8x32xbf16>, vector<32x128xbf16>, vector<8x128xf32> -> vector<8x128xf32>
    %132 = arith.addf %128, %131 : vector<8x128xf32>
    %c0_65 = arith.constant 0 : index
    %c0_66 = arith.constant 0 : index
    %133 = vector.load %arg11[%c0_65, %c0_66] : memref<1x128xf32, #tpu.memory_space<vmem>>, vector<1x128xf32>
    %134 = vector.broadcast %133 : vector<1x128xf32> to vector<8x128xf32>
    %135 = arith.addf %132, %134 : vector<8x128xf32>
    %c0_67 = arith.constant 0 : index
    %c0_68 = arith.constant 0 : index
    %136 = vector.load %arg12[%c0_67, %c0_68] : memref<8x128xf32, #tpu.memory_space<vmem>>, vector<8x128xf32>
    tpu.vector_store %arg12[%c0_67, %c0_68], %135 {strides = array<i32>} : memref<8x128xf32, #tpu.memory_space<vmem>>, vector<8x128xf32>,
    return
  }
  func.func @transform_0(%arg0: i32) -> (i32, i32) {
    %c0_i32 = arith.constant 0 : i32
    %c0_i32_0 = arith.constant 0 : i32
    return %arg0, %c0_i32 : i32, i32
  }
  func.func @transform_1(%arg0: i32) -> (i32, i32) {
    %c0_i32 = arith.constant 0 : i32
    %c0_i32_0 = arith.constant 0 : i32
    return %arg0, %c0_i32 : i32, i32
  }
  func.func @transform_2(%arg0: i32) -> (i32, i32, i32) {
    %c0_i32 = arith.constant 0 : i32
    %c0_i32_0 = arith.constant 0 : i32
    %c0_i32_1 = arith.constant 0 : i32
    return %arg0, %c0_i32, %c0_i32_0 : i32, i32, i32
  }
  func.func @transform_3(%arg0: i32) -> (i32, i32, i32) {
    %c0_i32 = arith.constant 0 : i32
    %c0_i32_0 = arith.constant 0 : i32
    %c0_i32_1 = arith.constant 0 : i32
    return %arg0, %c0_i32, %c0_i32_0 : i32, i32, i32
  }
  func.func @transform_4(%arg0: i32) -> (i32, i32) {
    %c0_i32 = arith.constant 0 : i32
    %c0_i32_0 = arith.constant 0 : i32
    %c0_i32_1 = arith.constant 0 : i32
    return %c0_i32, %c0_i32_0 : i32, i32
  }
  func.func @transform_5(%arg0: i32) -> (i32, i32) {
    %c0_i32 = arith.constant 0 : i32
    %c0_i32_0 = arith.constant 0 : i32
    %c0_i32_1 = arith.constant 0 : i32
    return %c0_i32, %c0_i32_0 : i32, i32
  }
  func.func @transform_6(%arg0: i32) -> (i32, i32) {
    %c0_i32 = arith.constant 0 : i32
    %c0_i32_0 = arith.constant 0 : i32
    %c0_i32_1 = arith.constant 0 : i32
    return %c0_i32, %c0_i32_0 : i32, i32
  }
  func.func @transform_7(%arg0: i32) -> (i32, i32) {
    %c0_i32 = arith.constant 0 : i32
    %c0_i32_0 = arith.constant 0 : i32
    %c0_i32_1 = arith.constant 0 : i32
    return %c0_i32, %c0_i32_0 : i32, i32
  }
  func.func @transform_8(%arg0: i32) -> (i32, i32) {
    %c0_i32 = arith.constant 0 : i32
    %c0_i32_0 = arith.constant 0 : i32
    %c0_i32_1 = arith.constant 0 : i32
    return %c0_i32, %c0_i32_0 : i32, i32
  }
  func.func @transform_9(%arg0: i32) -> (i32, i32) {
    %c0_i32 = arith.constant 0 : i32
    %c0_i32_0 = arith.constant 0 : i32
    %c0_i32_1 = arith.constant 0 : i32
    return %c0_i32, %c0_i32_0 : i32, i32
  }
  func.func @transform_10(%arg0: i32) -> (i32, i32) {
    %c0_i32 = arith.constant 0 : i32
    %c0_i32_0 = arith.constant 0 : i32
    %c0_i32_1 = arith.constant 0 : i32
    return %c0_i32, %c0_i32_0 : i32, i32
  }
  func.func @transform_11(%arg0: i32) -> (i32, i32) {
    %c0_i32 = arith.constant 0 : i32
    %c0_i32_0 = arith.constant 0 : i32
    return %arg0, %c0_i32 : i32, i32
  }
}

</mosaic_0001>

<bundles_post_ra>
// kernel: bt_model_forward.1
= control target key start
LH: loop header
LB: loop body
LE: loop exit
PB: predicated region body
PF: predicated region fallthrough
CT: control target
= control target key end

     0   :  { %16 = vsyncpa [#allocation3], 0  ;;  %s1988_s0 = inlined_call_operand.vmem [shape: f32[8,8], index: 0, kind: input, shape index: {}]   ;;  %s1989_s1 = inlined_call_operand.vmem [shape: f32[8,8], index: 1, kind: input, shape index: {}]   ;;  %s1990_s2 = inlined_call_operand.hbm [shape: f32[8,8,32], index: 2, kind: input, shape index: {}]   ;;  %s1991_s3 = inlined_call_operand.hbm [shape: f32[8,8,32], index: 3, kind: input, shape index: {}]   ;;  %s1992_s4 = inlined_call_operand.vmem [shape: bf16[32,32], index: 4, kind: input, shape index: {}]   ;;  %s1993_s5 = inlined_call_operand.vmem [shape: f32[1,32], index: 5, kind: input, shape index: {}]   ;;  %s1994_s6 = inlined_call_operand.vmem [shape: bf16[32,32], index: 6, kind: input, shape index: {}]   ;;  %s1995_s7 = inlined_call_operand.vmem [shape: f32[1,32], index: 7, kind: input, shape index: {}]   ;;  %s1996_s8 = inlined_call_operand.hbm [shape: bf16[32,128], index: 8, kind: input, shape index: {}]   ;;  %s1997_s9 = inlined_call_operand.hbm [shape: bf16[32,128], index: 9, kind: input, shape index: {}]   ;;  %s1998_s10 = inlined_call_operand.vmem [shape: f32[1,128], index: 10, kind: input, shape index: {}]   ;;  %s1999_s11 = inlined_call_operand.vmem [shape: f32[8,128], index: 11, kind: output, shape index: {}]  }
   0x1   :  { %17 = vsyncpa [#allocation5], 0 }
   0x2   :  { %18 = vsyncpa [#allocation8], 0  ;;  %s1416_s17 = smov [#allocation4]   ;;  %s1417_s19 = smov [#allocation2]  }
   0x3   :  { %s40_s18 = sshll.u32 %s1416_s17, 4  ;;  %s28_s20 = sshll.u32 %s1417_s19, 4  ;;  %s41_s18 = int_to_ptr.vmem [resolvable:$true] %s40_s18  ;;  %s29_s20 = int_to_ptr.vmem [resolvable:$true] %s28_s20 }
   0x4   :  { %s1338_s21 = scalar_lea.vmem %s41_s18, 1024  ;;  %p1343_p1 = scmp.lt.s32.totalorder %s41_s18, %s41_s18 }
   0x5   :  { %p1339_p0 = scmp.ne.s32.totalorder %s41_s18, %s1338_s21  ;;  %p1344_p2 = scmp.lt.s32.totalorder %s1338_s21, %s1338_s21 }
   0x7   :  { %p1345_p3 = por %p1344_p2, %p1343_p1 }
   0x9   :  { %p1346_p4 = pnand %p1345_p3, %p1339_p0 }
   0xb   :  { %1349 = shalt.err (!%p1346_p4)
}
   0xc   :  { %s1418_s22 = smov 128   ;;  %s1419_s23 = smov 8  }
   0xd   :  { %46 = dma.hbm_to_vmem [thread:$0]  %s1991_s3, 1024, %s41_s18, [#allocation5], %s1418_s22, %s1418_s22, %s1419_s23  }
   0xe   :  { %s1358_s26 = scalar_lea.vmem %s29_s20, 1024  ;;  %p1363_p6 = scmp.lt.s32.totalorder %s29_s20, %s29_s20 }
   0xf   :  { %p1359_p5 = scmp.ne.s32.totalorder %s29_s20, %s1358_s26  ;;  %p1364_p7 = scmp.lt.s32.totalorder %s1358_s26, %s1358_s26 }
  0x11   :  { %p1365_p8 = por %p1364_p7, %p1363_p6 }
  0x13   :  { %p1366_p9 = pnand %p1365_p8, %p1359_p5 }
  0x15   :  { %1369 = shalt.err (!%p1366_p9)
}
  0x16   :  { %34 = dma.hbm_to_vmem [thread:$0]  %s1990_s2, 1024, %s29_s20, [#allocation3], %s1418_s22, %s1418_s22, %s1419_s23  }
  0x17   :  { %s1420_s29 = smov [#allocation6]  }
  0x18   :  { %s60_s30 = sshll.u32 %s1420_s29, 4  ;;  %s61_s30 = int_to_ptr.vmem [resolvable:$true] %s60_s30 }
  0x19   :  { %s1378_s12 = scalar_lea.vmem %s61_s30, 256  ;;  %p1383_p11 = scmp.lt.s32.totalorder %s61_s30, %s61_s30 }
  0x1a   :  { %p1379_p10 = scmp.ne.s32.totalorder %s61_s30, %s1378_s12  ;;  %p1384_p12 = scmp.lt.s32.totalorder %s1378_s12, %s1378_s12 }
  0x1c   :  { %p1385_p13 = por %p1384_p12, %p1383_p11 }
  0x1e   :  { %p1386_p0 = pnand %p1385_p13, %p1379_p10 }
  0x20   :  { %1389 = shalt.err (!%p1386_p0)
}
  0x21   :  { %s1421_s3 = smov 64   ;;  %s1422_s13 = smov 4  }
  0x22   :  { %66 = dma.hbm_to_vmem [thread:$0]  %s1996_s8, 256, %s61_s30, [#allocation5], %s1421_s3, %s1421_s3, %s1422_s13  }
  0x23   :  { %s1423_s16 = smov [#allocation7]  }
  0x24   :  { %s72_s17 = sshll.u32 %s1423_s16, 4  ;;  %s73_s17 = int_to_ptr.vmem [resolvable:$true] %s72_s17 }
  0x25   :  { %s1398_s2 = scalar_lea.vmem %s73_s17, 256  ;;  %p1403_p2 = scmp.lt.s32.totalorder %s73_s17, %s73_s17 }
  0x26   :  { %p1399_p1 = scmp.ne.s32.totalorder %s73_s17, %s1398_s2  ;;  %p1404_p3 = scmp.lt.s32.totalorder %s1398_s2, %s1398_s2 }
  0x28   :  { %p1405_p4 = por %p1404_p3, %p1403_p2 }
  0x2a   :  { %p1406_p5 = pnand %p1405_p4, %p1399_p1 }
  0x2c   :  { %1409 = shalt.err (!%p1406_p5)
}
  0x2d   :  { %78 = dma.hbm_to_vmem [thread:$0]  %s1997_s9, 256, %s73_s17, [#allocation8], %s1421_s3, %s1421_s3, %s1422_s13  }
  0x2e   :  { %1410 = dma.done.wait [#allocation3], 1024  }
  0x2f   :  { %1411 = vsyncadd [#allocation3], 4294966272 }
  0x30   :  { %1412 = dma.done.wait [#allocation5], 1280  }
  0x31   :  { %1413 = vsyncadd [#allocation5], 4294966016 }
  0x32   :  { %1414 = dma.done.wait [#allocation8], 256  }
  0x33   :  { %1415 = vsyncadd [#allocation8], 4294967040  ;;  %v1424_v0 = vmov 0   ;;  %v1425_v1 = vmov 1   ;;  %vm770_vm0 = vcmask 64512   ;;  %v94_v2 = vld [vmem:[%s1988_s0] sm:$0xff] }
  0x34   :  { %1276 = vset.pattern.permute.xlu1 %v1424_v0  ;;  %1277 = vset.pattern.permute.xlu0 %v1425_v1  ;;  %v95_v3 = vld [vmem:[%s1989_s1] sm:$0xff]  ;;  %v771_v4 = vsel %vm770_vm0, %v94_v2, 0.0  ;;  %v1426_v6 = vmov 2   ;;  %v1427_v7 = vmov 3   ;;  %v1428_v8 = vmov 4   ;;  %v1286_v12 = vld [vmem:[%s1992_s4 + $0x8] sm:$0xff]  }
  0x35   :  { %106 = vperm.xlu1 %1276, %v94_v2   ;;  %772 = vadd.xlane.f32.xlu0 %v771_v4  ;;  %v807_v5 = vsel %vm770_vm0, %v95_v3, 0.0  ;;  %v1429_v9 = vmov 7   ;;  %v1430_v10 = vmov 5   ;;  %v1431_v11 = vmov 6   ;;  %v1287_v14 = vld [vmem:[%s1992_s4] sm:$0xff]   ;;  %v1288_v15 = vld [vmem:[%s1994_s6 + $0x8] sm:$0xff]  }
  0x36   :  { %v2000_v13 = vmov 0.0   ;;  %vm1433_vm1 = vmmov 0   ;;  %v1289_v17 = vld [vmem:[%s1994_s6] sm:$0xff]   ;;  %v97_v20 = vld [vmem:[#allocation2 + $0x8] sm:$0x1]  ;;  %vm879_vm2 = vcmask 1041409  }
  0x37   :  { %1226 = vmatprep.subr.bf16.mxu0 %v2000_v13  ;;  %1230 = vmatprep.mubr.msk.bf16.mxu0 %vm1433_vm1, %v2000_v13  ;;  %v96_v19 = vld [vmem:[#allocation2] sm:$0x1]  ;;  %v98_v21 = vld [vmem:[#allocation2 + $0x10] sm:$0x1]  ;;  %v99_v26 = vld [vmem:[#allocation2 + $0x18] sm:$0x1] }
  0x38   :  { %1227 = vmatpush3.bf16.msra.mxu0 %v1286_v12  ;;  %1234 = vmatprep.subr.bf16.mxu1 %v2000_v13  ;;  %v100_v27 = vld [vmem:[#allocation2 + $0x20] sm:$0x1]  ;;  %v101_v31 = vld [vmem:[#allocation2 + $0x28] sm:$0x1]  ;;  %v102_v32 = vld [vmem:[#allocation2 + $0x30] sm:$0x1] }
  0x39   :  { %149 = vperm.xlu1 %1276, %v95_v3   ;;  %808 = vadd.xlane.f32.xlu0 %v807_v5  ;;  %v103_v33 = vld [vmem:[#allocation2 + $0x38] sm:$0x1]  ;;  %v224_v40 = vld [vmem:[#allocation4 + $0x1] sm:$0x1]  ;;  %v225_v41 = vld [vmem:[#allocation4 + $0x9] sm:$0x1] }
  0x3a   :  { %1228 = vmatprep.subr.bf16.mxu0 %v2000_v13  ;;  %1238 = vmatprep.mubr.msk.bf16.mxu1 %vm1433_vm1, %v2000_v13  ;;  %v226_v42 = vld [vmem:[#allocation4 + $0x11] sm:$0x1]  ;;  %v227_v45 = vld [vmem:[#allocation4 + $0x19] sm:$0x1]  ;;  %v228_v46 = vld [vmem:[#allocation4 + $0x21] sm:$0x1] }
  0x3b   :  { %1235 = vmatpush3.bf16.msra.mxu1 %v1288_v15  ;;  %v139_v49 = vld [vmem:[#allocation4] sm:$0x1]  ;;  %v140_v50 = vld [vmem:[#allocation4 + $0x8] sm:$0x1]  ;;  %v141_v51 = vld [vmem:[#allocation4 + $0x10] sm:$0x1] }
  0x3c   :  { %1229 = vmatpush3.bf16.msra.mxu0 %v1287_v14  ;;  %1236 = vmatprep.subr.bf16.mxu1 %v2000_v13  ;;  %v229_v52 = vld [vmem:[#allocation4 + $0x29] sm:$0x1]  ;;  %v142_v59 = vld [vmem:[#allocation4 + $0x18] sm:$0x1]  ;;  %v143_v60 = vld [vmem:[#allocation4 + $0x20] sm:$0x1] }
  0x3d   :  { %1278 = vset.pattern.permute.xlu1 %v1425_v1  ;;  %1242 = vmatprep.subr.bf16.mxu0 %v2000_v13  ;;  %v230_v63 = vld [vmem:[#allocation4 + $0x31] sm:$0x1]  ;;  %v231_v5 = vld [vmem:[#allocation4 + $0x39] sm:$0x1]  ;;  %v146_v12 = vld [vmem:[#allocation4 + $0x38] sm:$0x1] }
  0x3e   :  { %233 = vperm.xlu1 %1278, %v95_v3   ;;  %vm882_vm3 = vcmask 1042434   ;;  %vm885_vm4 = vcmask 1043459   ;;  %vm888_vm5 = vcmask 1044484   ;;  %vm891_vm6 = vcmask 1045509  }
  0x3f   :  { %1237 = vmatpush3.bf16.msra.mxu1 %v1289_v17  ;;  %vm894_vm7 = vcmask 1046534   ;;  %vm897_vm8 = vcmask 1047559   ;;  %vm912_vm9 = vcmask 261120  }
  0x40   :  { %1250 = vmatprep.subr.bf16.mxu1 %v2000_v13 }
  0x42   :  { %1279 = vset.pattern.permute.xlu1 %v1426_v6  ;;  %v144_v6 = vld [vmem:[#allocation4 + $0x28] sm:$0x1] }
  0x43   :  { %275 = vperm.xlu1 %1279, %v94_v2  }
  0x47   :  { %317 = vperm.xlu1 %1279, %v95_v3  }
  0x4b   :  { %1280 = vset.pattern.permute.xlu1 %v1427_v7  ;;  %v145_v7 = vld [vmem:[#allocation4 + $0x30] sm:$0x1] }
  0x4c   :  { %359 = vperm.xlu1 %1280, %v94_v2  }
  0x4f   :  { %191 = vperm.xlu0 %1277, %v94_v2  }
  0x50   :  { %401 = vperm.xlu1 %1280, %v95_v3  }
  0x53   :  { %1284 = vset.pattern.permute.xlu0 %v1429_v9 }
  0x54   :  { %1281 = vset.pattern.permute.xlu1 %v1428_v8  ;;  %695 = vperm.xlu0 %1284, %v94_v2  }
  0x55   :  { %443 = vperm.xlu1 %1281, %v94_v2  }
  0x59   :  { %485 = vperm.xlu1 %1281, %v95_v3  }
  0x5d   :  { %1282 = vset.pattern.permute.xlu1 %v1430_v10 }
  0x5e   :  { %527 = vperm.xlu1 %1282, %v94_v2  }
  0x62   :  { %569 = vperm.xlu1 %1282, %v95_v3  }
  0x66   :  { %1283 = vset.pattern.permute.xlu1 %v1431_v11 }
  0x67   :  { %611 = vperm.xlu1 %1283, %v94_v2  }
  0x6b   :  { %653 = vperm.xlu1 %1283, %v95_v3  }
  0x6f   :  { %1285 = vset.pattern.permute.xlu1 %v1429_v9 }
  0x70   :  { %737 = vperm.xlu1 %1285, %v95_v3  }
  0xb0   :  { %v107_v16 = vpop.permute.xlu1 %106 }
  0xb1   :  { %v108_v22 = vrot.slane %v107_v16, 1  ;;  %v109_v23 = vrot.slane %v107_v16, 2  ;;  %v110_v24 = vrot.slane %v107_v16, 3  ;;  %v111_v25 = vrot.slane %v107_v16, 4 }
  0xb2   :  { %v112_v28 = vrot.slane %v107_v16, 5  ;;  %v113_v29 = vrot.slane %v107_v16, 6  ;;  %v114_v34 = vrot.slane %v107_v16, 7  ;;  %v1536_v35 = vmul.f32 %v107_v16, %v96_v19 }
  0xb3   :  { %v1538_v36 = vmul.f32 %v108_v22, %v97_v20  ;;  %v1540_v37 = vmul.f32 %v109_v23, %v98_v21  ;;  %v1542_v38 = vmul.f32 %v110_v24, %v99_v26  ;;  %v1544_v39 = vmul.f32 %v111_v25, %v100_v27 }
  0xb4   :  { %v1533_v18 = vpop.permute.xlu1 %149  ;;  %v1546_v43 = vmul.f32 %v112_v28, %v101_v31  ;;  %v1548_v44 = vmul.f32 %v113_v29, %v102_v32  ;;  %v1552_v58 = vmul.f32 %v114_v34, %v103_v33  ;;  %v266_v32 = vld [vmem:[#allocation2 + $0x2] sm:$0x1] }
  0xb5   :  { %v151_v61 = vrot.slane %v1533_v18, 1  ;;  %v152_v62 = vrot.slane %v1533_v18, 2  ;;  %v153_v1 = vrot.slane %v1533_v18, 3  ;;  %v154_v2 = vrot.slane %v1533_v18, 4 }
  0xb6   :  { %2008 = vst [vmem:[#allocation12_spill] sm:$0xff] %v1552_v58  ;;  %v155_v3 = vrot.slane %v1533_v18, 5  ;;  %v156_v4 = vrot.slane %v1533_v18, 6  ;;  %v157_v8 = vrot.slane %v1533_v18, 7  ;;  %v166_v19 = vmul.f32 %v1533_v18, %v139_v49  ;;  %v310_v18 = vld [vmem:[#allocation4 + $0x12] sm:$0x1] }
  0xb7   :  { %v167_v20 = vmul.f32 %v151_v61, %v140_v50  ;;  %v168_v21 = vmul.f32 %v152_v62, %v141_v51  ;;  %v169_v23 = vmul.f32 %v153_v1, %v142_v59  ;;  %v170_v24 = vmul.f32 %v154_v2, %v143_v60  ;;  %v313_v59 = vld [vmem:[#allocation4 + $0x2a] sm:$0x1] }
  0xb8   :  { %v171_v25 = vmul.f32 %v155_v3, %v144_v6  ;;  %v172_v26 = vmul.f32 %v156_v4, %v145_v7  ;;  %v173_v28 = vmul.f32 %v157_v8, %v146_v12  ;;  %v314_v3 = vld [vmem:[#allocation4 + $0x32] sm:$0x1]  ;;  %v315_v12 = vld [vmem:[#allocation4 + $0x3a] sm:$0x1] }
  0xb9   :  { %v234_v30 = vpop.permute.xlu1 %233 }
  0xba   :  { %v235_v47 = vrot.slane %v234_v30, 1  ;;  %v236_v48 = vrot.slane %v234_v30, 2  ;;  %v237_v53 = vrot.slane %v234_v30, 3  ;;  %v238_v54 = vrot.slane %v234_v30, 4 }
  0xbb   :  { %v239_v55 = vrot.slane %v234_v30, 5  ;;  %v240_v56 = vrot.slane %v234_v30, 6  ;;  %v241_v0 = vrot.slane %v234_v30, 7  ;;  %v250_v9 = vmul.f32 %v234_v30, %v224_v40 }
  0xbc   :  { %v251_v10 = vmul.f32 %v235_v47, %v225_v41  ;;  %v252_v11 = vmul.f32 %v236_v48, %v226_v42  ;;  %v253_v14 = vmul.f32 %v237_v53, %v227_v45  ;;  %v254_v15 = vmul.f32 %v238_v54, %v228_v46  ;;  %v308_v42 = vld [vmem:[#allocation4 + $0x2] sm:$0x1]  ;;  %v309_v45 = vld [vmem:[#allocation4 + $0xa] sm:$0x1]  ;;  %v311_v46 = vld [vmem:[#allocation4 + $0x1a] sm:$0x1] }
  0xbd   :  { %v255_v16 = vmul.f32 %v239_v55, %v229_v52  ;;  %v256_v17 = vmul.f32 %v240_v56, %v230_v63  ;;  %v257_v22 = vmul.f32 %v241_v0, %v231_v5  ;;  %v258_v29 = vadd.f32 %v250_v9, %v166_v19  ;;  %v312_v48 = vld [vmem:[#allocation4 + $0x22] sm:$0x1]  ;;  %v267_v52 = vld [vmem:[#allocation2 + $0xa] sm:$0x1]  ;;  %v268_v53 = vld [vmem:[#allocation2 + $0x12] sm:$0x1] }
  0xbe   :  { %v1550_v57 = vpop.permute.xlu1 %275  ;;  %v259_v30 = vadd.f32 %v251_v10, %v167_v20  ;;  %v260_v31 = vadd.f32 %v252_v11, %v168_v21  ;;  %v261_v33 = vadd.f32 %v253_v14, %v169_v23  ;;  %v262_v34 = vadd.f32 %v254_v15, %v170_v24  ;;  %v269_v54 = vld [vmem:[#allocation2 + $0x1a] sm:$0x1]  ;;  %v270_v55 = vld [vmem:[#allocation2 + $0x22] sm:$0x1]  ;;  %v773_v4 = vpop.xlane.xlu0 %772  ;;  %v271_v5 = vld [vmem:[#allocation2 + $0x2a] sm:$0x1] }
  0xbf   :  { %v263_v40 = vadd.f32 %v255_v16, %v171_v25  ;;  %v264_v41 = vadd.f32 %v256_v17, %v172_v26  ;;  %v1562_v47 = vadd.f32 %v257_v22, %v173_v28  ;;  %v277_v56 = vrot.slane %v1550_v57, 1  ;;  %v272_v10 = vld [vmem:[#allocation2 + $0x32] sm:$0x1]  ;;  %v273_v11 = vld [vmem:[#allocation2 + $0x3a] sm:$0x1] }
  0xc0   :  { %v278_v63 = vrot.slane %v1550_v57, 2  ;;  %v279_v0 = vrot.slane %v1550_v57, 3  ;;  %v280_v1 = vrot.slane %v1550_v57, 4  ;;  %v281_v2 = vrot.slane %v1550_v57, 5 }
  0xc1   :  { %v282_v6 = vrot.slane %v1550_v57, 6  ;;  %v283_v7 = vrot.slane %v1550_v57, 7  ;;  %v1572_v8 = vmul.f32 %v1550_v57, %v266_v32  ;;  %v1574_v22 = vmax.f32 %v773_v4, 1.0  ;;  %v188_v4 = vld [vmem:[#allocation2 + $0x31] sm:$0x1] }
  0xc2   :  { %v318_v27 = vpop.permute.xlu1 %317  ;;  %v1576_v24 = vmul.f32 %v277_v56, %v267_v52  ;;  %v1578_v25 = vmul.f32 %v278_v63, %v268_v53  ;;  %v1580_v57 = vmul.f32 %v279_v0, %v269_v54  ;;  %v1582_v26 = vmul.f32 %v280_v1, %v270_v55  ;;  %v351_v55 = vld [vmem:[#allocation2 + $0xb] sm:$0x1]  ;;  %v352_v56 = vld [vmem:[#allocation2 + $0x13] sm:$0x1] }
  0xc3   :  { %v319_v49 = vrot.slane %v318_v27, 1  ;;  %v320_v50 = vrot.slane %v318_v27, 2  ;;  %v321_v51 = vrot.slane %v318_v27, 3  ;;  %v322_v60 = vrot.slane %v318_v27, 4  ;;  %2009 = vst [vmem:[#allocation13_spill] sm:$0xff] %v1574_v22 }
  0xc4   :  { %v323_v61 = vrot.slane %v318_v27, 5  ;;  %v324_v62 = vrot.slane %v318_v27, 6  ;;  %v325_v9 = vrot.slane %v318_v27, 7  ;;  %v334_v14 = vmul.f32 %v318_v27, %v308_v42  ;;  %v355_v1 = vld [vmem:[#allocation2 + $0x2b] sm:$0x1] }
  0xc5   :  { %v335_v15 = vmul.f32 %v319_v49, %v309_v45  ;;  %v336_v16 = vmul.f32 %v320_v50, %v310_v18  ;;  %v337_v17 = vmul.f32 %v321_v51, %v311_v46  ;;  %v338_v19 = vmul.f32 %v322_v60, %v312_v48  ;;  %v350_v49 = vld [vmem:[#allocation2 + $0x3] sm:$0x1]  ;;  %v809_v50 = vpop.xlane.xlu0 %808 }
  0xc6   :  { %v339_v20 = vmul.f32 %v323_v61, %v313_v59  ;;  %v340_v21 = vmul.f32 %v324_v62, %v314_v3  ;;  %v1584_v28 = vmul.f32 %v281_v2, %v271_v5  ;;  %v1586_v27 = vmul.f32 %v282_v6, %v272_v10  ;;  %v354_v61 = vld [vmem:[#allocation2 + $0x23] sm:$0x1]  ;;  %v356_v2 = vld [vmem:[#allocation2 + $0x33] sm:$0x1]  ;;  %v357_v5 = vld [vmem:[#allocation2 + $0x3b] sm:$0x1] }
  0xc7   :  { %v360_v23 = vpop.permute.xlu1 %359  ;;  %v1588_v32 = vmul.f32 %v283_v7, %v273_v11  ;;  %v341_v42 = vmul.f32 %v325_v9, %v315_v12  ;;  %v1590_v45 = vadd.f32 %v334_v14, %v258_v29  ;;  %v1592_v18 = vadd.f32 %v335_v15, %v259_v30  ;;  %v353_v30 = vld [vmem:[#allocation2 + $0x1b] sm:$0x1] }
  0xc8   :  { %2010 = vst [vmem:[#allocation14_spill] sm:$0xff] %v1584_v28  ;;  %2011 = vst [vmem:[#allocation15_spill] sm:$0xff] %v1586_v27  ;;  %v1594_v46 = vadd.f32 %v336_v16, %v260_v31  ;;  %v1596_v48 = vadd.f32 %v337_v17, %v261_v33  ;;  %v1598_v51 = vadd.f32 %v338_v19, %v262_v34  ;;  %v776_v54 = vrot.slane %v1574_v22, 1  ;;  %v399_v28 = vld [vmem:[#allocation4 + $0x3b] sm:$0x1] }
  0xc9   :  { %2012 = vst [vmem:[#allocation16_spill] sm:$0xff] %v1588_v32  ;;  %v1600_v52 = vadd.f32 %v339_v20, %v263_v40  ;;  %v1602_v53 = vadd.f32 %v340_v21, %v264_v41  ;;  %v777_v29 = vrot.slane %v1574_v22, 2  ;;  %v361_v59 = vrot.slane %v360_v23, 1  ;;  %v182_v20 = vld [vmem:[#allocation2 + $0x1] sm:$0x1] }
  0xca   :  { %v362_v31 = vrot.slane %v360_v23, 2  ;;  %v363_v60 = vrot.slane %v360_v23, 3  ;;  %v778_v33 = vrot.slane %v1574_v22, 3  ;;  %v364_v62 = vrot.slane %v360_v23, 4  ;;  %v1625_v11 = vpop.permute.xlu0 %191  ;;  %v183_v21 = vld [vmem:[#allocation2 + $0x9] sm:$0x1] }
  0xcb   :  { %2013 = vst [vmem:[#allocation17_spill] sm:$0xff] %v1602_v53  ;;  %v365_v34 = vrot.slane %v360_v23, 5  ;;  %v366_v63 = vrot.slane %v360_v23, 6  ;;  %v1607_v40 = vpop.permute.xlu1 %401  ;;  %v1610_v41 = vadd.f32 %v341_v42, %v1562_v47  ;;  %v779_v0 = vrot.slane %v1574_v22, 4  ;;  %v392_v42 = vld [vmem:[#allocation4 + $0x3] sm:$0x1] }
  0xcc   :  { %1294 = vrcp.f32 %v1574_v22  ;;  %v367_v3 = vrot.slane %v360_v23, 7  ;;  %v1615_v6 = vmul.f32 %v360_v23, %v350_v49  ;;  %v1617_v7 = vmax.f32 %v809_v50, 1.0 }
  0xcd   :  { %2014 = vst [vmem:[#allocation18_spill] sm:$0xff] %v1610_v41  ;;  %1296 = vrcp.f32 %v776_v54  ;;  %v1619_v9 = vmul.f32 %v361_v59, %v351_v55  ;;  %v1621_v47 = vmul.f32 %v362_v31, %v352_v56  ;;  %v1623_v10 = vmul.f32 %v363_v60, %v353_v30  ;;  %v184_v54 = vld [vmem:[#allocation2 + $0x11] sm:$0x1]  ;;  %v185_v55 = vld [vmem:[#allocation2 + $0x19] sm:$0x1] }
  0xce   :  { %2015 = vst [vmem:[#allocation19_spill] sm:$0xff] %v1615_v6  ;;  %2016 = vst [vmem:[#allocation20_spill] sm:$0xff] %v1617_v7  ;;  %1298 = vrcp.f32 %v777_v29  ;;  %v1627_v12 = vmul.f32 %v364_v62, %v354_v61  ;;  %v1629_v14 = vmul.f32 %v365_v34, %v355_v1  ;;  %v1631_v15 = vmul.f32 %v366_v63, %v356_v2  ;;  %v393_v59 = vld [vmem:[#allocation4 + $0xb] sm:$0x1]  ;;  %v186_v31 = vld [vmem:[#allocation2 + $0x21] sm:$0x1] }
  0xcf   :  { %2017 = vst [vmem:[#allocation21_spill] sm:$0xff] %v1619_v9  ;;  %2018 = vst [vmem:[#allocation22_spill] sm:$0xff] %v1621_v47  ;;  %1300 = vrcp.f32 %v778_v33  ;;  %v1633_v16 = vmul.f32 %v367_v3, %v357_v5  ;;  %v403_v17 = vrot.slane %v1607_v40, 1  ;;  %v404_v19 = vrot.slane %v1607_v40, 2  ;;  %v394_v63 = vld [vmem:[#allocation4 + $0x13] sm:$0x1] }
  0xd0   :  { %2019 = vst [vmem:[#allocation23_spill] sm:$0xff] %v1623_v10  ;;  %2020 = vst [vmem:[#allocation24_spill] sm:$0xff] %v1627_v12  ;;  %1302 = vrcp.f32 %v779_v0  ;;  %v812_v23 = vrot.slane %v1617_v7, 1  ;;  %v405_v49 = vrot.slane %v1607_v40, 3  ;;  %v406_v50 = vrot.slane %v1607_v40, 4  ;;  %v1641_v29 = vpop.permute.xlu1 %443 }
  0xd1   :  { %2021 = vst [vmem:[#allocation25_spill] sm:$0xff] %v1629_v14  ;;  %2022 = vst [vmem:[#allocation26_spill] sm:$0xff] %v1631_v15  ;;  %v193_v56 = vrot.slane %v1625_v11, 1  ;;  %v813_v30 = vrot.slane %v1617_v7, 2  ;;  %v194_v60 = vrot.slane %v1625_v11, 2  ;;  %v195_v33 = vrot.slane %v1625_v11, 3 }
  0xd2   :  { %2023 = vst [vmem:[#allocation27_spill] sm:$0xff] %v1633_v16  ;;  %2024 = vst [vmem:[#allocation28_spill] sm:$0xff] %v1641_v29  ;;  %v196_v61 = vrot.slane %v1625_v11, 4  ;;  %v814_v62 = vrot.slane %v1617_v7, 3  ;;  %v815_v34 = vrot.slane %v1617_v7, 4  ;;  %v197_v1 = vrot.slane %v1625_v11, 5 }
  0xd3   :  { %v187_v0 = vld [vmem:[#allocation2 + $0x29] sm:$0x1]  ;;  %v198_v2 = vrot.slane %v1625_v11, 6  ;;  %1304 = vrcp.f32 %v1617_v7  ;;  %v407_v5 = vrot.slane %v1607_v40, 5  ;;  %v408_v13 = vrot.slane %v1607_v40, 6 }
  0xd4   :  { %1306 = vrcp.f32 %v812_v23  ;;  %v395_v41 = vld [vmem:[#allocation4 + $0x1b] sm:$0x1]  ;;  %v396_v16 = vld [vmem:[#allocation4 + $0x23] sm:$0x1]  ;;  %v409_v22 = vrot.slane %v1607_v40, 7  ;;  %v208_v32 = vmul.f32 %v1625_v11, %v182_v20  ;;  %v209_v15 = vmul.f32 %v193_v56, %v183_v21  ;;  %v1659_v23 = vpop.permute.xlu1 %485 }
  0xd5   :  { %v397_v14 = vld [vmem:[#allocation4 + $0x2b] sm:$0x1]  ;;  %v418_v12 = vmul.f32 %v1607_v40, %v392_v42  ;;  %v210_v10 = vmul.f32 %v194_v60, %v184_v54  ;;  %v211_v3 = vmul.f32 %v195_v33, %v185_v55  ;;  %v212_v47 = vmul.f32 %v196_v61, %v186_v31  ;;  %v398_v7 = vld [vmem:[#allocation4 + $0x33] sm:$0x1]  ;;  %v189_v21 = vld [vmem:[#allocation2 + $0x39] sm:$0x1] }
  0xd6   :  { %v419_v9 = vmul.f32 %v403_v17, %v393_v59  ;;  %v199_v6 = vrot.slane %v1625_v11, 7  ;;  %v213_v29 = vmul.f32 %v197_v1, %v187_v0  ;;  %v214_v27 = vmul.f32 %v198_v2, %v188_v4  ;;  %v2033_v31 = vld [vmem:[#allocation21_spill] sm:$0xff]  ;;  %v2034_v0 = vld [vmem:[#allocation22_spill] sm:$0xff] }
  0xd7   :  { %1308 = vrcp.f32 %v813_v30  ;;  %v420_v58 = vmul.f32 %v404_v19, %v394_v63  ;;  %v421_v53 = vmul.f32 %v405_v49, %v395_v41  ;;  %v422_v20 = vmul.f32 %v406_v50, %v396_v16  ;;  %v437_v50 = vld [vmem:[#allocation2 + $0x1c] sm:$0x1]  ;;  %v440_v63 = vld [vmem:[#allocation2 + $0x34] sm:$0x1] }
  0xd8   :  { %1310 = vrcp.f32 %v814_v62  ;;  %v423_v40 = vmul.f32 %v407_v5, %v397_v14  ;;  %v216_v42 = vadd.f32 %v208_v32, %v1536_v35  ;;  %v217_v17 = vadd.f32 %v209_v15, %v1538_v36  ;;  %v2032_v30 = vld [vmem:[#allocation19_spill] sm:$0xff]  ;;  %v2036_v5 = vld [vmem:[#allocation24_spill] sm:$0xff] }
  0xd9   :  { %v1661_v56 = vpop.eup %1294  ;;  %v424_v11 = vmul.f32 %v408_v13, %v398_v7  ;;  %v218_v4 = vadd.f32 %v210_v10, %v1540_v37  ;;  %v219_v55 = vadd.f32 %v211_v3, %v1542_v38  ;;  %v220_v19 = vadd.f32 %v212_v47, %v1544_v39  ;;  %v435_v47 = vld [vmem:[#allocation2 + $0xc] sm:$0x1]  ;;  %v2031_v10 = vld [vmem:[#allocation28_spill] sm:$0xff]  ;;  %v2035_v2 = vld [vmem:[#allocation23_spill] sm:$0xff] }
  0xda   :  { %v1665_v54 = vpop.eup %1296  ;;  %v1672_v16 = vmul.f32 %v409_v22, %v399_v28  ;;  %v215_v49 = vmul.f32 %v199_v6, %v189_v21  ;;  %v221_v14 = vadd.f32 %v213_v29, %v1546_v43  ;;  %v222_v35 = vadd.f32 %v214_v27, %v1548_v44  ;;  %v1697_v28 = vpop.permute.xlu1 %527  ;;  %v438_v29 = vld [vmem:[#allocation2 + $0x24] sm:$0x1] }
  0xdb   :  { %v1670_v41 = vpop.eup %1298  ;;  %1312 = vrcp.f32 %v815_v34  ;;  %v1679_v13 = vadd.f32 %v418_v12, %v1590_v45  ;;  %v1682_v36 = vadd.f32 %v419_v9, %v1592_v18  ;;  %v1685_v37 = vadd.f32 %v420_v58, %v1594_v46  ;;  %v2027_v46 = vld [vmem:[#allocation17_spill] sm:$0xff]  ;;  %v434_v9 = vld [vmem:[#allocation2 + $0x4] sm:$0x1] }
  0xdc   :  { %2025 = vst [vmem:[#allocation29_spill] sm:$0xff] %v1672_v16  ;;  %v1676_v32 = vpop.eup %1300  ;;  %v1690_v39 = vadd.f32 %v421_v53, %v1596_v48  ;;  %v1693_v43 = vadd.f32 %v422_v20, %v1598_v51  ;;  %v300_v44 = vadd.f32 %v1572_v8, %v216_v42  ;;  %v301_v22 = vadd.f32 %v1576_v24, %v217_v17  ;;  %v2028_v51 = vld [vmem:[#allocation12_spill] sm:$0xff]  ;;  %v2029_v8 = vld [vmem:[#allocation14_spill] sm:$0xff]  ;;  %v2030_v24 = vld [vmem:[#allocation15_spill] sm:$0xff] }
  0xdd   :  { %v1687_v38 = vpop.eup %1302  ;;  %v1700_v27 = vadd.f32 %v423_v40, %v1600_v52  ;;  %v302_v58 = vadd.f32 %v1578_v25, %v218_v4  ;;  %v303_v45 = vadd.f32 %v1580_v57, %v219_v55  ;;  %v304_v18 = vadd.f32 %v1582_v26, %v220_v19  ;;  %v436_v52 = vld [vmem:[#allocation2 + $0x14] sm:$0x1]  ;;  %v439_v34 = vld [vmem:[#allocation2 + $0x2c] sm:$0x1]  ;;  %v441_v40 = vld [vmem:[#allocation2 + $0x3c] sm:$0x1] }
  0xde   :  { %2026 = vst [vmem:[#allocation30_spill] sm:$0xff] %v1687_v38  ;;  %v1706_v48 = vadd.f32 %v424_v11, %v2027_v46  ;;  %v1709_v53 = vadd.f32 %v215_v49, %v2028_v51  ;;  %v305_v6 = vadd.f32 %v2029_v8, %v221_v14  ;;  %v306_v7 = vadd.f32 %v2030_v24, %v222_v35  ;;  %v2037_v42 = vld [vmem:[#allocation25_spill] sm:$0xff]  ;;  %v2038_v11 = vld [vmem:[#allocation26_spill] sm:$0xff]  ;;  %v1733_v49 = vpop.permute.xlu1 %569 }
  0xdf   :  { %v445_v12 = vrot.slane %v2031_v10, 1  ;;  %v446_v25 = vrot.slane %v2031_v10, 2  ;;  %v447_v57 = vrot.slane %v2031_v10, 3  ;;  %v448_v26 = vrot.slane %v2031_v10, 4  ;;  %2039 = vst [vmem:[#allocation17_spill] sm:$0xff] %v1733_v49 }
  0xe0   :  { %v1717_v15 = vpop.eup %1304  ;;  %v384_v59 = vadd.f32 %v2032_v30, %v300_v44  ;;  %v385_v60 = vadd.f32 %v2033_v31, %v301_v22  ;;  %v449_v33 = vrot.slane %v2031_v10, 5  ;;  %v450_v61 = vrot.slane %v2031_v10, 6  ;;  %v478_v8 = vld [vmem:[#allocation4 + $0x14] sm:$0x1]  ;;  %v566_v38 = vld [vmem:[#allocation4 + $0x35] sm:$0x1] }
  0xe1   :  { %v1723_v62 = vpop.eup %1306  ;;  %v386_v1 = vadd.f32 %v2034_v0, %v302_v58  ;;  %v387_v3 = vadd.f32 %v2035_v2, %v303_v45  ;;  %v388_v20 = vadd.f32 %v2036_v5, %v304_v18  ;;  %v451_v21 = vrot.slane %v2031_v10, 7  ;;  %v476_v58 = vld [vmem:[#allocation4 + $0x4] sm:$0x1]  ;;  %v477_v45 = vld [vmem:[#allocation4 + $0xc] sm:$0x1] }
  0xe2   :  { %v389_v17 = vadd.f32 %v2037_v42, %v305_v6  ;;  %v390_v4 = vadd.f32 %v2038_v11, %v306_v7  ;;  %v460_v55 = vmul.f32 %v2031_v10, %v434_v9  ;;  %v487_v19 = vrot.slane %v1659_v23, 1  ;;  %v479_v6 = vld [vmem:[#allocation4 + $0x1c] sm:$0x1]  ;;  %v1762_v42 = vpop.permute.xlu1 %611 }
  0xe3   :  { %v461_v14 = vmul.f32 %v445_v12, %v435_v47  ;;  %v462_v35 = vmul.f32 %v446_v25, %v436_v52  ;;  %v463_v44 = vmul.f32 %v447_v57, %v437_v50  ;;  %v464_v22 = vmul.f32 %v448_v26, %v438_v29  ;;  %v480_v47 = vld [vmem:[#allocation4 + $0x24] sm:$0x1]  ;;  %v481_v26 = vld [vmem:[#allocation4 + $0x2c] sm:$0x1]  ;;  %v482_v50 = vld [vmem:[#allocation4 + $0x34] sm:$0x1] }
  0xe4   :  { %v1735_v18 = vpop.eup %1308  ;;  %v465_v46 = vmul.f32 %v449_v33, %v439_v34  ;;  %v466_v51 = vmul.f32 %v450_v61, %v440_v63  ;;  %v488_v24 = vrot.slane %v1659_v23, 2  ;;  %v489_v7 = vrot.slane %v1659_v23, 3  ;;  %v483_v0 = vld [vmem:[#allocation4 + $0x3c] sm:$0x1] }
  0xe5   :  { %v1739_v9 = vpop.eup %1310  ;;  %v1741_v10 = vmul.f32 %v451_v21, %v441_v40  ;;  %v490_v52 = vrot.slane %v1659_v23, 4  ;;  %v491_v12 = vrot.slane %v1659_v23, 5  ;;  %v492_v25 = vrot.slane %v1659_v23, 6 }
  0xe6   :  { %2040 = vst [vmem:[#allocation12_spill] sm:$0xff] %v1739_v9  ;;  %v1746_v57 = vadd.f32 %v460_v55, %v384_v59  ;;  %v493_v29 = vrot.slane %v1659_v23, 7  ;;  %v502_v30 = vmul.f32 %v1659_v23, %v476_v58  ;;  %v503_v31 = vmul.f32 %v487_v19, %v477_v45  ;;  %v519_v55 = vld [vmem:[#allocation2 + $0xd] sm:$0x1] }
  0xe7   :  { %v469_v33 = vadd.f32 %v461_v14, %v385_v60  ;;  %v1750_v61 = vadd.f32 %v462_v35, %v386_v1  ;;  %v1752_v34 = vadd.f32 %v463_v44, %v387_v3  ;;  %v1754_v63 = vadd.f32 %v464_v22, %v388_v20  ;;  %v518_v1 = vld [vmem:[#allocation2 + $0x5] sm:$0x1]  ;;  %v521_v14 = vld [vmem:[#allocation2 + $0x1d] sm:$0x1] }
  0xe8   :  { %v1756_v2 = vpop.eup %1312  ;;  %v1758_v5 = vadd.f32 %v465_v46, %v389_v17  ;;  %v1760_v59 = vadd.f32 %v466_v51, %v390_v4  ;;  %v504_v21 = vmul.f32 %v488_v24, %v478_v8  ;;  %v505_v40 = vmul.f32 %v489_v7, %v479_v6  ;;  %v520_v4 = vld [vmem:[#allocation2 + $0x15] sm:$0x1]  ;;  %v522_v44 = vld [vmem:[#allocation2 + $0x25] sm:$0x1]  ;;  %v603_v6 = vld [vmem:[#allocation2 + $0xe] sm:$0x1] }
  0xe9   :  { %2041 = vst [vmem:[#allocation14_spill] sm:$0xff] %v1756_v2  ;;  %v506_v23 = vmul.f32 %v490_v52, %v480_v47  ;;  %v507_v11 = vmul.f32 %v491_v12, %v481_v26  ;;  %v508_v60 = vmul.f32 %v492_v25, %v482_v50  ;;  %v529_v3 = vrot.slane %v1697_v28, 1  ;;  %v604_v25 = vld [vmem:[#allocation2 + $0x16] sm:$0x1]  ;;  %v562_v26 = vld [vmem:[#allocation4 + $0x15] sm:$0x1] }
  0xea   :  { %v1765_v20 = vmul.f32 %v493_v29, %v483_v0  ;;  %v1768_v19 = vadd.f32 %v502_v30, %v1679_v13  ;;  %v1771_v17 = vadd.f32 %v503_v31, %v1682_v36  ;;  %v530_v35 = vrot.slane %v1697_v28, 2  ;;  %v523_v36 = vld [vmem:[#allocation2 + $0x2d] sm:$0x1]  ;;  %v602_v30 = vld [vmem:[#allocation2 + $0x6] sm:$0x1] }
  0xeb   :  { %v531_v22 = vrot.slane %v1697_v28, 3  ;;  %v532_v58 = vrot.slane %v1697_v28, 4  ;;  %v533_v45 = vrot.slane %v1697_v28, 5  ;;  %v613_v46 = vrot.slane %v1762_v42, 1 }
  0xec   :  { %2042 = vst [vmem:[#allocation15_spill] sm:$0xff] %v1765_v20  ;;  %v1779_v51 = vadd.f32 %v504_v21, %v1685_v37  ;;  %v1782_v13 = vadd.f32 %v505_v40, %v1690_v39  ;;  %v534_v8 = vrot.slane %v1697_v28, 6  ;;  %v614_v24 = vrot.slane %v1762_v42, 2  ;;  %v524_v37 = vld [vmem:[#allocation2 + $0x35] sm:$0x1]  ;;  %v1795_v39 = vpop.permute.xlu0 %695 }
  0xed   :  { %v1787_v7 = vadd.f32 %v506_v23, %v1693_v43  ;;  %v1790_v47 = vadd.f32 %v507_v11, %v1700_v27  ;;  %v1793_v52 = vadd.f32 %v508_v60, %v1706_v48  ;;  %v545_v12 = vmul.f32 %v529_v3, %v519_v55  ;;  %v605_v21 = vld [vmem:[#allocation2 + $0x1e] sm:$0x1]  ;;  %v687_v11 = vld [vmem:[#allocation2 + $0xf] sm:$0x1] }
  0xee   :  { %v544_v50 = vmul.f32 %v1697_v28, %v518_v1  ;;  %v546_v29 = vmul.f32 %v530_v35, %v520_v4  ;;  %v615_v43 = vrot.slane %v1762_v42, 3  ;;  %v547_v31 = vmul.f32 %v531_v22, %v521_v14  ;;  %v688_v35 = vld [vmem:[#allocation2 + $0x17] sm:$0x1] }
  0xef   :  { %2043 = vst [vmem:[#allocation28_spill] sm:$0xff] %v1793_v52  ;;  %v548_v0 = vmul.f32 %v532_v58, %v522_v44  ;;  %v1800_v27 = vmul.f32 %v533_v45, %v523_v36  ;;  %v629_v48 = vmul.f32 %v613_v46, %v603_v6  ;;  %v1802_v40 = vmul.f32 %v534_v8, %v524_v37  ;;  %v686_v46 = vld [vmem:[#allocation2 + $0x7] sm:$0x1]  ;;  %v560_v36 = vld [vmem:[#allocation4 + $0x5] sm:$0x1] }
  0xf0   :  { %v630_v23 = vmul.f32 %v614_v24, %v604_v25  ;;  %v697_v60 = vrot.slane %v1795_v39, 1  ;;  %v698_v55 = vrot.slane %v1795_v39, 2  ;;  %v571_v1 = vrot.slane %v1733_v49, 1  ;;  %v561_v8 = vld [vmem:[#allocation4 + $0xd] sm:$0x1] }
  0xf1   :  { %2044 = vst [vmem:[#allocation19_spill] sm:$0xff] %v1802_v40  ;;  %v572_v3 = vrot.slane %v1733_v49, 2  ;;  %v628_v4 = vmul.f32 %v1762_v42, %v602_v30  ;;  %v553_v14 = vadd.f32 %v545_v12, %v469_v33  ;;  %v573_v44 = vrot.slane %v1733_v49, 3  ;;  %v689_v52 = vld [vmem:[#allocation2 + $0x1f] sm:$0x1] }
  0xf2   :  { %v574_v22 = vrot.slane %v1733_v49, 4  ;;  %v631_v58 = vmul.f32 %v615_v43, %v605_v21  ;;  %v554_v45 = vadd.f32 %v546_v29, %v1750_v61  ;;  %v552_v6 = vadd.f32 %v544_v50, %v1746_v57  ;;  %v563_v43 = vld [vmem:[#allocation4 + $0x1d] sm:$0x1]  ;;  %v606_v21 = vld [vmem:[#allocation2 + $0x26] sm:$0x1] }
  0xf3   :  { %v637_v24 = vadd.f32 %v629_v48, %v553_v14  ;;  %v699_v37 = vrot.slane %v1795_v39, 3  ;;  %v713_v25 = vmul.f32 %v697_v60, %v687_v11  ;;  %v575_v33 = vrot.slane %v1733_v49, 5  ;;  %v564_v50 = vld [vmem:[#allocation4 + $0x25] sm:$0x1]  ;;  %v1826_v14 = vpop.permute.xlu1 %653 }
  0xf4   :  { %v616_v12 = vrot.slane %v1762_v42, 4  ;;  %v638_v30 = vadd.f32 %v630_v23, %v554_v45  ;;  %v714_v20 = vmul.f32 %v698_v55, %v688_v35  ;;  %v617_v61 = vrot.slane %v1762_v42, 5  ;;  %v607_v55 = vld [vmem:[#allocation2 + $0x2e] sm:$0x1]  ;;  %v565_v35 = vld [vmem:[#allocation4 + $0x2d] sm:$0x1] }
  0xf5   :  { %v555_v29 = vadd.f32 %v547_v31, %v1752_v34  ;;  %v636_v2 = vadd.f32 %v628_v4, %v552_v6  ;;  %v712_v57 = vmul.f32 %v1795_v39, %v686_v46  ;;  %v576_v48 = vrot.slane %v1733_v49, 6 }
  0xf6   :  { %v1822_v60 = vmul.f32 %v1733_v49, %v560_v36  ;;  %v1824_v23 = vmul.f32 %v571_v1, %v561_v8  ;;  %v1828_v45 = vmul.f32 %v572_v3, %v562_v26  ;;  %v715_v31 = vmul.f32 %v699_v37, %v689_v52  ;;  %v690_v1 = vld [vmem:[#allocation2 + $0x27] sm:$0x1]  ;;  %v691_v3 = vld [vmem:[#allocation2 + $0x2f] sm:$0x1] }
  0xf7   :  { %v639_v34 = vadd.f32 %v631_v58, %v555_v29  ;;  %v721_v4 = vadd.f32 %v713_v25, %v637_v24  ;;  %v1830_v46 = vmul.f32 %v573_v44, %v563_v43  ;;  %v632_v6 = vmul.f32 %v616_v12, %v606_v21  ;;  %v608_v58 = vld [vmem:[#allocation2 + $0x36] sm:$0x1] }
  0xf8   :  { %v700_v16 = vrot.slane %v1795_v39, 4  ;;  %v722_v11 = vadd.f32 %v714_v20, %v638_v30  ;;  %v1833_v9 = vmul.f32 %v574_v22, %v564_v50  ;;  %v633_v36 = vmul.f32 %v617_v61, %v607_v55  ;;  %v692_v22 = vld [vmem:[#allocation2 + $0x37] sm:$0x1]  ;;  %v646_v50 = vld [vmem:[#allocation4 + $0x16] sm:$0x1] }
  0xf9   :  { %v701_v8 = vrot.slane %v1795_v39, 5  ;;  %v720_v49 = vadd.f32 %v712_v57, %v636_v2  ;;  %v1836_v40 = vmul.f32 %v575_v33, %v565_v35  ;;  %v618_v26 = vrot.slane %v1762_v42, 6  ;;  %v693_v33 = vld [vmem:[#allocation2 + $0x3f] sm:$0x1] }
  0xfa   :  { %v556_v52 = vadd.f32 %v548_v0, %v1754_v63  ;;  %v702_v44 = vrot.slane %v1795_v39, 6  ;;  %v557_v20 = vadd.f32 %v1800_v27, %v1758_v5  ;;  %v703_v24 = vrot.slane %v1795_v39, 7  ;;  %v1847_v0 = vpop.permute.xlu1 %737  ;;  %v645_v27 = vld [vmem:[#allocation4 + $0xe] sm:$0x1] }
  0xfb   :  { %v723_v37 = vadd.f32 %v715_v31, %v639_v34  ;;  %v794_v2 = vmul.f32 %v1665_v54, %v721_v4  ;;  %v716_v12 = vmul.f32 %v700_v16, %v690_v1  ;;  %v796_v30 = vmul.f32 %v1670_v41, %v722_v11  ;;  %v644_v4 = vld [vmem:[#allocation4 + $0x6] sm:$0x1]  ;;  %v647_v1 = vld [vmem:[#allocation4 + $0x1e] sm:$0x1] }
  0xfc   :  { %v640_v25 = vadd.f32 %v632_v6, %v556_v52  ;;  %v655_v63 = vrot.slane %v1826_v14, 1  ;;  %v1849_v43 = vmul.f32 %v576_v48, %v566_v38  ;;  %v641_v21 = vadd.f32 %v633_v36, %v557_v20  ;;  %v729_v48 = vld [vmem:[#allocation4 + $0xf] sm:$0x1]  ;;  %v730_v36 = vld [vmem:[#allocation4 + $0x17] sm:$0x1] }
  0xfd   :  { %v717_v61 = vmul.f32 %v701_v8, %v691_v3  ;;  %v792_v5 = vmul.f32 %v1661_v56, %v720_v49  ;;  %v619_v39 = vrot.slane %v1762_v42, 7  ;;  %v1853_v29 = vmul.f32 %v618_v26, %v608_v58  ;;  %v648_v8 = vld [vmem:[#allocation4 + $0x26] sm:$0x1] }
  0xfe   :  { %v1855_v54 = vmul.f32 %v702_v44, %v692_v22  ;;  %v656_v16 = vrot.slane %v1826_v14, 2  ;;  %v1858_v41 = vmul.f32 %v703_v24, %v693_v33  ;;  %v1861_v57 = vmul.f32 %v1676_v32, %v723_v37  ;;  %v649_v22 = vld [vmem:[#allocation4 + $0x2e] sm:$0x1]  ;;  %v2054_v42 = vld [vmem:[#allocation12_spill] sm:$0xff] }
  0xff   :  { %v844_v38 = vpack.c.bf16 %v794_v2, %v794_v2  ;;  %v739_v11 = vrot.slane %v1847_v0, 1  ;;  %v1864_v56 = vadd.f32 %v716_v12, %v640_v25  ;;  %v845_v49 = vpack.c.bf16 %v796_v30, %v796_v30  ;;  %v728_v12 = vld [vmem:[#allocation4 + $0x7] sm:$0x1] }
 0x100   :  { %v671_v55 = vmul.f32 %v655_v63, %v645_v27  ;;  %v740_v35 = vrot.slane %v1847_v0, 2  ;;  %v1867_v34 = vadd.f32 %v717_v61, %v641_v21  ;;  %v843_v31 = vpack.c.bf16 %v792_v5, %v792_v5 }
 0x101   :  { %v657_v6 = vrot.slane %v1826_v14, 3  ;;  %v658_v32 = vrot.slane %v1826_v14, 4  ;;  %v659_v26 = vrot.slane %v1826_v14, 5  ;;  %v672_v52 = vmul.f32 %v656_v16, %v646_v50 }
 0x102   :  { %v595_v3 = vadd.f32 %v1824_v23, %v1771_v17  ;;  %v755_v44 = vmul.f32 %v739_v11, %v729_v48  ;;  %v846_v58 = vpack.c.bf16 %v1861_v57, %v1861_v57  ;;  %v1876_v20 = vunpack.c.l.b16 %v844_v38  ;;  %v650_v23 = vld [vmem:[#allocation4 + $0x36] sm:$0x1]  ;;  %v2045_v11 = vld [vmem:[#allocation16_spill] sm:$0xff] }
 0x103   :  { %v660_v24 = vrot.slane %v1826_v14, 6  ;;  %v661_v37 = vrot.slane %v1826_v14, 7  ;;  %v1880_v2 = vunpack.c.l.b16 %v845_v49  ;;  %v596_v25 = vadd.f32 %v1828_v45, %v1779_v51  ;;  %v731_v45 = vld [vmem:[#allocation4 + $0x1f] sm:$0x1] }
 0x104   :  { %v679_v33 = vadd.f32 %v671_v55, %v595_v3  ;;  %v756_v30 = vmul.f32 %v740_v35, %v730_v36  ;;  %v1884_v17 = vunpack.c.l.b16 %v843_v31  ;;  %v670_v63 = vmul.f32 %v1826_v14, %v644_v4  ;;  %v2046_v4 = vld [vmem:[#allocation13_spill] sm:$0xff]  ;;  %v525_v3 = vld [vmem:[#allocation2 + $0x3d] sm:$0x1] }
 0x105   :  { %v673_v21 = vmul.f32 %v657_v6, %v647_v1  ;;  %v674_v61 = vmul.f32 %v658_v32, %v648_v8  ;;  %v675_v5 = vmul.f32 %v659_v26, %v649_v22  ;;  %v680_v27 = vadd.f32 %v672_v52, %v596_v25  ;;  %v732_v8 = vld [vmem:[#allocation4 + $0x27] sm:$0x1] }
 0x106   :  { %v741_v16 = vrot.slane %v1847_v0, 3  ;;  %v763_v38 = vadd.f32 %v755_v44, %v679_v33  ;;  %v878_v50 = vrot.slane %v1876_v20, 7  ;;  %v594_v51 = vadd.f32 %v1822_v60, %v1768_v19 }
 0x107   :  { %v754_v48 = vmul.f32 %v1847_v0, %v728_v12  ;;  %v307_v49 = vadd.f32 %v2045_v11, %v1709_v53  ;;  %v881_v55 = vrot.slane %v1880_v2, 6  ;;  %v1895_v35 = vmul.f32 %v660_v24, %v650_v23  ;;  %v2051_v11 = vld [vmem:[#allocation30_spill] sm:$0xff] }
 0x108   :  { %v764_v31 = vadd.f32 %v756_v30, %v680_v27  ;;  %v781_v6 = vrot.slane %v2046_v4, 6  ;;  %v597_v32 = vadd.f32 %v1830_v46, %v1782_v13  ;;  %v678_v36 = vadd.f32 %v670_v63, %v594_v51  ;;  %v2047_v46 = vld [vmem:[#allocation27_spill] sm:$0xff] }
 0x109   :  { %v742_v1 = vrot.slane %v1847_v0, 4  ;;  %v782_v19 = vrot.slane %v2046_v4, 7  ;;  %v598_v60 = vadd.f32 %v1833_v9, %v1787_v7  ;;  %v599_v53 = vadd.f32 %v1836_v40, %v1790_v47  ;;  %v733_v9 = vld [vmem:[#allocation4 + $0x2f] sm:$0x1]  ;;  %v609_v47 = vld [vmem:[#allocation2 + $0x3e] sm:$0x1] }
 0x10a   :  { %v757_v26 = vmul.f32 %v741_v16, %v731_v45  ;;  %v830_v52 = vmul.f32 %v1723_v62, %v763_v38  ;;  %v743_v44 = vrot.slane %v1847_v0, 5  ;;  %v762_v13 = vadd.f32 %v754_v48, %v678_v36  ;;  %v734_v38 = vld [vmem:[#allocation4 + $0x37] sm:$0x1]  ;;  %v735_v51 = vld [vmem:[#allocation4 + $0x3f] sm:$0x1] }
 0x10b   :  { %v391_v22 = vadd.f32 %v2047_v46, %v307_v49  ;;  %v2048_v24 = vrot.slane %v2046_v4, 5  ;;  %v681_v25 = vadd.f32 %v673_v21, %v597_v32  ;;  %v682_v33 = vadd.f32 %v674_v61, %v598_v60  ;;  %v2050_v45 = vld [vmem:[#allocation19_spill] sm:$0xff] }
 0x10c   :  { %v832_v7 = vmul.f32 %v1735_v18, %v764_v31  ;;  %v683_v40 = vadd.f32 %v675_v5, %v599_v53  ;;  %v758_v12 = vmul.f32 %v742_v1, %v732_v8  ;;  %v2049_v62 = vrot.slane %v1697_v28, 7  ;;  %v567_v1 = vld [vmem:[#allocation4 + $0x3d] sm:$0x1] }
 0x10d   :  { %1314 = vrcp.f32 %v2048_v24  ;;  %v744_v23 = vrot.slane %v1847_v0, 6  ;;  %v745_v63 = vrot.slane %v1847_v0, 7  ;;  %v765_v27 = vadd.f32 %v757_v26, %v681_v25  ;;  %v2052_v0 = vld [vmem:[#allocation20_spill] sm:$0xff] }
 0x10e   :  { %1316 = vrcp.f32 %v781_v6  ;;  %v551_v30 = vmul.f32 %v2049_v62, %v525_v3  ;;  %v958_v16 = vpack.c.bf16 %v830_v52, %v830_v52  ;;  %v759_v21 = vmul.f32 %v743_v44, %v733_v9  ;;  %v651_v52 = vld [vmem:[#allocation4 + $0x3e] sm:$0x1]  ;;  %v2055_v44 = vld [vmem:[#allocation18_spill] sm:$0xff]  ;;  %v2061_v62 = vld [vmem:[#allocation28_spill] sm:$0xff] }
 0x10f   :  { %1318 = vrcp.f32 %v782_v19  ;;  %v828_v61 = vmul.f32 %v1717_v15, %v762_v13  ;;  %v475_v18 = vadd.f32 %v1741_v10, %v391_v22  ;;  %v635_v5 = vmul.f32 %v619_v39, %v609_v47  ;;  %v2056_v13 = vld [vmem:[#allocation29_spill] sm:$0xff]  ;;  %v2059_v47 = vld [vmem:[#allocation14_spill] sm:$0xff] }
 0x110   :  { %v959_v28 = vpack.c.bf16 %v832_v7, %v832_v7  ;;  %v558_v48 = vadd.f32 %v2050_v45, %v1760_v59  ;;  %v800_v49 = vmul.f32 %v2051_v11, %v1864_v56  ;;  %v817_v31 = vrot.slane %v2052_v0, 6  ;;  %v2057_v22 = vld [vmem:[#allocation17_spill] sm:$0xff] }
 0x111   :  { %v766_v4 = vadd.f32 %v758_v12, %v682_v33  ;;  %v559_v6 = vadd.f32 %v551_v30, %v475_v18  ;;  %v818_v15 = vrot.slane %v2052_v0, 7  ;;  %v2053_v10 = vrot.slane %v2052_v0, 5 }
 0x112   :  { %v834_v39 = vmul.f32 %v2054_v42, %v765_v27  ;;  %v985_v32 = vunpack.c.l.b16 %v958_v16  ;;  %v642_v36 = vadd.f32 %v1853_v29, %v558_v48  ;;  %v760_v59 = vmul.f32 %v744_v23, %v734_v38 }
 0x113   :  { %1320 = vrcp.f32 %v2053_v10  ;;  %v761_v19 = vmul.f32 %v745_v63, %v735_v51  ;;  %v643_v56 = vadd.f32 %v635_v5, %v559_v6  ;;  %v767_v60 = vadd.f32 %v759_v21, %v683_v40 }
 0x114   :  { %1322 = vrcp.f32 %v817_v31  ;;  %v957_v53 = vpack.c.bf16 %v828_v61, %v828_v61  ;;  %v986_v8 = vunpack.c.l.b16 %v959_v28  ;;  %v847_v26 = vpack.c.bf16 %v800_v49, %v800_v49 }
 0x115   :  { %1324 = vrcp.f32 %v818_v15  ;;  %v873_v3 = vunpack.c.l.b16 %v846_v58  ;;  %v880_v29 = vsel %vm879_vm2, %v878_v50, %v1884_v17  ;;  %v433_v46 = vadd.f32 %v2056_v13, %v2055_v44  ;;  %v2060_v58 = vld [vmem:[#allocation15_spill] sm:$0xff] }
 0x116   :  { %v2058_v24 = vrot.slane %v2057_v22, 7  ;;  %v960_v33 = vpack.c.bf16 %v834_v39, %v834_v39  ;;  %v992_v9 = vrot.slane %v985_v32, 7  ;;  %v726_v7 = vadd.f32 %v1855_v54, %v642_v36 }
 0x117   :  { %v836_v40 = vmul.f32 %v2059_v47, %v766_v4  ;;  %v727_v57 = vadd.f32 %v1858_v41, %v643_v56  ;;  %v517_v12 = vadd.f32 %v2060_v58, %v433_v46  ;;  %v600_v20 = vadd.f32 %v1849_v43, %v2061_v62  ;;  %v1290_v62 = vld [vmem:[#allocation6 + $0x8] sm:$0xff]  }
 0x118   :  { %v593_v25 = vmul.f32 %v2058_v24, %v567_v1  ;;  %v677_v17 = vmul.f32 %v661_v37, %v651_v52  ;;  %v984_v30 = vunpack.c.l.b16 %v957_v53  ;;  %v994_v23 = vrot.slane %v986_v8, 6 }
 0x119   :  { %v874_v63 = vunpack.c.l.b16 %v847_v26  ;;  %v883_v54 = vsel %vm882_vm3, %v881_v55, %v880_v29  ;;  %v884_v41 = vrot.slane %v873_v3, 5  ;;  %v684_v61 = vadd.f32 %v1895_v35, %v600_v20  ;;  %v1292_v20 = vld [vmem:[#allocation7 + $0x8] sm:$0xff]  }
 0x11a   :  { %v1315_v50 = vpop.eup %1314  ;;  %v601_v21 = vadd.f32 %v593_v25, %v517_v12  ;;  %v961_v5 = vpack.c.bf16 %v836_v40, %v836_v40  ;;  %v987_v14 = vunpack.c.l.b16 %v960_v33  ;;  %v993_v37 = vsel %vm879_vm2, %v992_v9, %v984_v30  ;;  %v1199_v30 = vld [vmem:[%s1993_s5] ss:$0 sm:$0xff] }
 0x11b   :  { %v1317_v27 = vpop.eup %1316  ;;  %v802_v16 = vmul.f32 %v1315_v50, %v1867_v34  ;;  %v886_v28 = vsel %vm885_vm4, %v884_v41, %v883_v54  ;;  %v887_v55 = vrot.slane %v874_v63, 4  ;;  %v768_v48 = vadd.f32 %v760_v59, %v684_v61  ;;  %v1293_v50 = vld [vmem:[#allocation7] sm:$0xff]  }
 0x11c   :  { %v1319_v18 = vpop.eup %1318  ;;  %v804_v43 = vmul.f32 %v1317_v27, %v726_v7  ;;  %v685_v2 = vadd.f32 %v677_v17, %v601_v21  ;;  %v995_v35 = vsel %vm882_vm3, %v994_v23, %v993_v37  ;;  %v988_v6 = vunpack.c.l.b16 %v961_v5  ;;  %v1291_v17 = vld [vmem:[#allocation6] sm:$0xff]  }
 0x11d   :  { %v806_v38 = vmul.f32 %v1319_v18, %v727_v57  ;;  %v848_v51 = vpack.c.bf16 %v802_v16, %v802_v16  ;;  %v889_v4 = vsel %vm888_vm5, %v887_v55, %v886_v28  ;;  %v996_v15 = vrot.slane %v987_v14, 5  ;;  %v1203_v16 = vld [vmem:[%s1995_s7] ss:$0 sm:$0xff] }
 0x11e   :  { %v849_v45 = vpack.c.bf16 %v804_v43, %v804_v43  ;;  %v769_v49 = vadd.f32 %v761_v19, %v685_v2  ;;  %v998_v29 = vrot.slane %v988_v6, 4  ;;  %v2062_v40 = vmov 0.0  }
 0x11f   :  { %v850_v34 = vpack.c.bf16 %v806_v38, %v806_v38  ;;  %v875_v11 = vunpack.c.l.b16 %v848_v51  ;;  %v997_v56 = vsel %vm885_vm4, %v996_v15, %v995_v35 }
 0x120   :  { %v1321_v0 = vpop.eup %1320  ;;  %v876_v31 = vunpack.c.l.b16 %v849_v45  ;;  %v999_v24 = vsel %vm888_vm5, %v998_v29, %v997_v56 }
 0x121   :  { %v1323_v10 = vpop.eup %1322  ;;  %v877_v42 = vunpack.c.l.b16 %v850_v34  ;;  %v890_v39 = vrot.slane %v875_v11, 3  ;;  %v838_v32 = vmul.f32 %v1321_v0, %v767_v60  ;;  %v1213_v34 = vld [vmem:[%s1998_s10] ss:$0 sm:$0xff] }
 0x122   :  { %v1325_v36 = vpop.eup %1324  ;;  %v893_v1 = vrot.slane %v876_v31, 2  ;;  %v840_v59 = vmul.f32 %v1323_v10, %v768_v48 }
 0x123   :  { %v892_v19 = vsel %vm891_vm6, %v890_v39, %v889_v4  ;;  %v896_v53 = vrot.slane %v877_v42, 1  ;;  %v842_v8 = vmul.f32 %v1325_v36, %v769_v49  ;;  %v962_v26 = vpack.c.bf16 %v838_v32, %v838_v32 }
 0x124   :  { %v895_v52 = vsel %vm894_vm7, %v893_v1, %v892_v19  ;;  %v963_v3 = vpack.c.bf16 %v840_v59, %v840_v59 }
 0x125   :  { %v898_v44 = vsel %vm897_vm8, %v896_v53, %v895_v52  ;;  %v964_v13 = vpack.c.bf16 %v842_v8, %v842_v8  ;;  %v989_v60 = vunpack.c.l.b16 %v962_v26 }
 0x126   :  { %v899_v46 = vpack.c.b16 %v898_v44, %v898_v44  ;;  %v990_v22 = vunpack.c.l.b16 %v963_v3 }
 0x127   :  { %v991_v25 = vunpack.c.l.b16 %v964_v13  ;;  %v1000_v33 = vrot.slane %v989_v60, 3 }
 0x128   :  { %1231 = vmatmul.mubr.msk.bf16.vlgmr.msra.gmra.mxu0 %vm912_vm9, %v899_v46  ;;  %v1002_v9 = vrot.slane %v990_v22, 2 }
 0x129   :  { %v1001_v7 = vsel %vm891_vm6, %v1000_v33, %v999_v24  ;;  %v1004_v47 = vrot.slane %v991_v25, 1  ;;  %1246 = vmatprep.mubr.msk.bf16.mxu0 %vm1433_vm1, %v2062_v40  ;;  %1243 = vmatpush3.bf16.msra.mxu0 %v1290_v62 }
 0x12a   :  { %v1003_v57 = vsel %vm894_vm7, %v1002_v9, %v1001_v7  ;;  %1244 = vmatprep.subr.bf16.mxu0 %v2062_v40 }
 0x12b   :  { %v1005_v58 = vsel %vm897_vm8, %v1004_v47, %v1003_v57 }
 0x12c   :  { %v1006_v12 = vpack.c.b16 %v1005_v58, %v1005_v58 }
 0x12d   :  { %1245 = vmatpush3.bf16.msra.mxu0 %v1291_v17 }
 0x12e   :  { %1239 = vmatmul.mubr.msk.bf16.vlgmr.msra.gmra.mxu1 %vm912_vm9, %v1006_v12 }
 0x12f   :  { %1254 = vmatprep.mubr.msk.bf16.mxu1 %vm1433_vm1, %v2062_v40  ;;  %1251 = vmatpush3.bf16.msra.mxu1 %v1292_v20 }
 0x130   :  { %1252 = vmatprep.subr.bf16.mxu1 %v2062_v40 }
 0x133   :  { %1253 = vmatpush3.bf16.msra.mxu1 %v1293_v50 }
 0x1e8   :  { %v950_v23 = vpop.f32.mrf.mxu0 }
 0x1e9   :  { %v951_v63 = vadd.f32 %v1199_v30, %v950_v23 }
 0x1ea   :  { %v1232_v54 = vpop.f32.mrf.mxu0 }
 0x1eb   :  { %1326 = vtanh.f32 %v951_v63 }
 0x1ec   :  { %v953_v27 = vpop.f32.mrf.mxu0 }
 0x1ee   :  { %v1233_v41 = vpop.f32.mrf.mxu0  ;;  %v1056_v21 = vpop.f32.mrf.mxu1 }
 0x1ef   :  { %v1057_v61 = vadd.f32 %v1203_v16, %v1056_v21 }
 0x1f0   :  { %v1240_v18 = vpop.f32.mrf.mxu1 }
 0x1f1   :  { %1328 = vtanh.f32 %v1057_v61 }
 0x1f2   :  { %v1059_v43 = vpop.f32.mrf.mxu1 }
 0x1f4   :  { %v1241_v5 = vpop.f32.mrf.mxu1 }
 0x1f8   :  { %v1327_v14 = vpop.eup %1326 }
 0x1f9   :  { %v1068_v37 = vpack.c.bf16 %v1327_v14, %v1327_v14 }
 0x1fb   :  { %1247 = vmatmul.mubr.msk.bf16.vlgmr.msra.gmra.mxu0 %vm912_vm9, %v1068_v37 }
 0x1fe   :  { %v1329_v38 = vpop.eup %1328 }
 0x1ff   :  { %v1063_v51 = vpack.c.bf16 %v1329_v38, %v1329_v38 }
 0x201   :  { %1255 = vmatmul.mubr.msk.bf16.vlgmr.msra.gmra.mxu1 %vm912_vm9, %v1063_v51 }
 0x2bb   :  { %v1122_v28 = vpop.f32.mrf.mxu0 }
 0x2bd   :  { %v1248_v2 = vpop.f32.mrf.mxu0 }
 0x2bf   :  { %v1125_v45 = vpop.f32.mrf.mxu0 }
 0x2c1   :  { %v1249_v55 = vpop.f32.mrf.mxu0  ;;  %v1177_v48 = vpop.f32.mrf.mxu1 }
 0x2c2   :  { %v1178_v11 = vadd.f32 %v1177_v48, %v1122_v28 }
 0x2c3   :  { %v1256_v49 = vpop.f32.mrf.mxu1 }
 0x2c4   :  { %v1190_v35 = vadd.f32 %v1213_v34, %v1178_v11 }
 0x2c5   :  { %v1180_v0 = vpop.f32.mrf.mxu1 }
 0x2c6   :  { %1191 = vst [vmem:[%s1999_s11] sm:$0xff] %v1190_v35 }
 0x2c7   :  { %v1257_v31 = vpop.f32.mrf.mxu1 }
 0x2c8   :  { %1196 = vsyncpa [#allocation3], 1 }
 0x2c9   :  { %1197 = vsyncpa [#allocation5], 1 }
 0x2ca   :  { %1198 = vsyncpa [#allocation8], 1 }

</bundles_post_ra>
